<compile_context>
chip_gen: v5e
topology: v5e:2x2
jax: 0.10.0
libtpu: 0.0.40
codegen_flags: <defaults>
</compile_context>

<pallas_src>
import jax
import jax.numpy as jnp
from jax.experimental import pallas as pl
from jax.experimental.pallas import tpu as pltpu

EPS = 1e-5


# ---------------------------------------------------------------------------
# In-kernel helper: 3x3 "same" conv of one zero-padded image as three
# accumulating MXU matmuls (one per dy offset), K = 3*C each.
#   xpad: (H+2, W+2, C) zero-padded activations (value already in VMEM)
#   w:    (9*C, Cout) bf16 taps flattened as K = (dy*3 + dx)*C + c
# returns (H*W, Cout) float32.
# ---------------------------------------------------------------------------
def _conv3x3_folded(xpad, w):
    HP, WP, C = xpad.shape
    H, W = HP - 2, WP - 2
    # three dx-shifted copies, built once and reused for every dy -> (H+2, W, 3C)
    slab = jnp.concatenate(
        [xpad[:, 0:W, :], xpad[:, 1:W + 1, :], xpad[:, 2:W + 2, :]],
        axis=-1).astype(jnp.bfloat16)
    acc = None
    for dy in range(3):                         # static unroll; no slab9 buffer
        part = jnp.dot(slab[dy:H + dy].reshape(H * W, 3 * C),
                       w[dy * 3 * C:(dy + 1) * 3 * C, :],
                       preferred_element_type=jnp.float32)
        acc = part if acc is None else acc + part
    return acc                                   # (H*W, Cout) f32


def _pad_hw(x):
    """Zero-pad H and W by 1 with value-level concats (no scratch double-store)."""
    H, W, C = x.shape
    zrow = jnp.zeros((1, W, C), x.dtype)
    zcol = jnp.zeros((H + 2, 1, C), x.dtype)
    xp = jnp.concatenate([zrow, x, zrow], axis=0)       # (H+2, W,   C)
    return jnp.concatenate([zcol, xp, zcol], axis=1)    # (H+2, W+2, C)


# ------------------------- pass 1: conv1 + BN1 partial sums ----------------
def _conv1_kernel(x_ref, w_ref, y_ref, st_ref):
    # x_ref: (1, H, W, Cin) f32; w_ref: (9*Cin, Cout) bf16
    # y_ref: (1, H, W, Cout) bf16; st_ref: (1, 2, Cout) f32
    x = x_ref[0]
    H, W, _ = x.shape
    y = _conv3x3_folded(_pad_hw(x), w_ref[...])          # (H*W, Cout) f32
    # per-tile partial sums for the cross-tile (two-pass) BatchNorm, from f32
    st_ref[0] = jnp.concatenate(
        [jnp.sum(y, axis=0, keepdims=True),
         jnp.sum(y * y, axis=0, keepdims=True)], axis=0)
    y_ref[0] = y.reshape(H, W, -1).astype(y_ref.dtype)   # bf16 writeback


# -------------- pass 2: BN1 affine + ReLU + conv2 + BN2 partial sums -------
def _bn_relu_conv2_kernel(y1_ref, sc_ref, sh_ref, w_ref, y2_ref, st_ref):
    h1 = jnp.maximum(
        y1_ref[0].astype(jnp.float32) * sc_ref[...] + sh_ref[...], 0.0)
    H, W, C = h1.shape
    y2 = _conv3x3_folded(_pad_hw(h1), w_ref[...])        # (H*W, C) f32
    st_ref[0] = jnp.concatenate(
        [jnp.sum(y2, axis=0, keepdims=True),
         jnp.sum(y2 * y2, axis=0, keepdims=True)], axis=0)
    y2_ref[0] = y2.reshape(H, W, C).astype(y2_ref.dtype)


# -------------- pass 3: BN2 affine + (projection) + residual + ReLU --------
def _bn_proj_add_relu_kernel(y2_ref, x_ref, sc_ref, sh_ref, wp_ref, o_ref):
    h2 = y2_ref[0].astype(jnp.float32) * sc_ref[...] + sh_ref[...]
    H, W, Cin = x_ref.shape[1], x_ref.shape[2], x_ref.shape[3]
    ident = jnp.dot(x_ref[0].reshape(H * W, Cin).astype(jnp.bfloat16),
                    wp_ref[...],
                    preferred_element_type=jnp.float32).reshape(H, W, -1)
    o_ref[0] = jnp.maximum(h2 + ident, 0.0).astype(o_ref.dtype)


def _bn_add_relu_kernel(y2_ref, x_ref, sc_ref, sh_ref, o_ref):
    # in_channels == out_channels: identity skip, no projection matmul at all
    h2 = y2_ref[0].astype(jnp.float32) * sc_ref[...] + sh_ref[...]
    o_ref[0] = jnp.maximum(h2 + x_ref[0], 0.0).astype(o_ref.dtype)


def residual_block(x_nchw, params):
    """Runs the Pallas kernels. x_nchw: (N, Cin, H, W). Returns (N, Cout, H, W)."""
    # b1/b2 are accepted but not used in the kernels: a per-channel conv bias
    # is exactly cancelled by the following train-mode BatchNorm.
    w1, b1, g1, be1, w2, b2, g2, be2, wp = params
    del b1, b2
    N, Cin, H, W = x_nchw.shape
    Cout = w1.shape[0]
    f32, bf16 = jnp.float32, jnp.bfloat16

    x = jnp.transpose(x_nchw, (0, 2, 3, 1)).astype(f32)            # NHWC

    # PyTorch (Cout, Cin, 3, 3) -> (9*Cin, Cout), K index = (dy*3 + dx)*Cin + c
    w1t = jnp.transpose(w1, (2, 3, 1, 0)).reshape(9 * Cin, Cout).astype(bf16)
    w2t = jnp.transpose(w2, (2, 3, 1, 0)).reshape(9 * Cout, Cout).astype(bf16)

    # TODO(synk): tune vmem_limit_bytes per generation (v5e/v6e up to ~100 MiB,
    #             v7x capped by 64 MiB physical) once row-tiling lands.
    cp = pltpu.CompilerParams(dimension_semantics=("parallel",),
                              vmem_limit_bytes=64 * 1024 * 1024)
    vec_spec = lambda c: pl.BlockSpec((1, c), lambda n: (0, 0))

    # ---------------- pass 1: conv1 + per-tile BN1 partial sums ------------
    y1, st1 = pl.pallas_call(
        _conv1_kernel,
        grid=(N,),
        in_specs=[pl.BlockSpec((1, H, W, Cin), lambda n: (n, 0, 0, 0)),
                  pl.BlockSpec((9 * Cin, Cout), lambda n: (0, 0))],
        out_specs=(pl.BlockSpec((1, H, W, Cout), lambda n: (n, 0, 0, 0)),
                   pl.BlockSpec((1, 2, Cout), lambda n: (n, 0, 0))),
        out_shape=(jax.ShapeDtypeStruct((N, H, W, Cout), bf16),
                   jax.ShapeDtypeStruct((N, 2, Cout), f32)),
        compiler_params=cp,
    )(x, w1t)

    cnt = jnp.float32(N * H * W)

    def _affine(st, g, be):
        s = jnp.sum(st[:, 0, :], axis=0)
        q = jnp.sum(st[:, 1, :], axis=0)
        mu = s / cnt
        var = jnp.maximum(q / cnt - mu * mu, 0.0)
        scale = g.astype(f32) * jax.lax.rsqrt(var + EPS)
        shift = be.astype(f32) - mu * scale
        return scale.reshape(1, Cout), shift.reshape(1, Cout)

    sc1, sh1 = _affine(st1, g1, be1)

    # ------- pass 2: BN1 affine + ReLU + conv2 + per-tile BN2 partial sums -
    y2, st2 = pl.pallas_call(
        _bn_relu_conv2_kernel,
        grid=(N,),
        in_specs=[pl.BlockSpec((1, H, W, Cout), lambda n: (n, 0, 0, 0)),
                  vec_spec(Cout), vec_spec(Cout),
                  pl.BlockSpec((9 * Cout, Cout), lambda n: (0, 0))],
        out_specs=(pl.BlockSpec((1, H, W, Cout), lambda n: (n, 0, 0, 0)),
                   pl.BlockSpec((1, 2, Cout), lambda n: (n, 0, 0))),
        out_shape=(jax.ShapeDtypeStruct((N, H, W, Cout), bf16),
                   jax.ShapeDtypeStruct((N, 2, Cout), f32)),
        compiler_params=cp,
    )(y1, sc1, sh1, w2t)

    sc2, sh2 = _affine(st2, g2, be2)

    # ---------- pass 3: BN2 affine + (projection) + residual add + ReLU ----
    common_in = [pl.BlockSpec((1, H, W, Cout), lambda n: (n, 0, 0, 0)),
                 pl.BlockSpec((1, H, W, Cin), lambda n: (n, 0, 0, 0)),
                 vec_spec(Cout), vec_spec(Cout)]
    out_spec = pl.BlockSpec((1, H, W, Cout), lambda n: (n, 0, 0, 0))
    out_shape = jax.ShapeDtypeStruct((N, H, W, Cout), x_nchw.dtype)

    if wp is None:
        out_nhwc = pl.pallas_call(
            _bn_add_relu_kernel, grid=(N,),
            in_specs=common_in, out_specs=out_spec, out_shape=out_shape,
            compiler_params=cp,
        )(y2, x, sc2, sh2)
    else:
        wpt = jnp.transpose(wp.reshape(Cout, Cin), (1, 0)).astype(bf16)
        out_nhwc = pl.pallas_call(
            _bn_proj_add_relu_kernel, grid=(N,),
            in_specs=common_in + [pl.BlockSpec((Cin, Cout), lambda n: (0, 0))],
            out_specs=out_spec, out_shape=out_shape,
            compiler_params=cp,
        )(y2, x, sc2, sh2, wpt)

    return jnp.transpose(out_nhwc, (0, 3, 1, 2))                   # back to NCHW


def residual_block_reference(x_nchw, params):
    """Pure-JAX f32 reference (same math as the PyTorch module, NHWC conv)."""
    w1, b1, g1, be1, w2, b2, g2, be2, wp = params
    x = jnp.transpose(x_nchw, (0, 2, 3, 1))

    def conv(h, w, b=None):
        y = jax.lax.conv_general_dilated(
            h, jnp.transpose(w, (2, 3, 1, 0)), (1, 1), 'SAME',
            dimension_numbers=('NHWC', 'HWIO', 'NHWC'))
        return y if b is None else y + b

    def bn(h, g, be):
        mu = h.mean(axis=(0, 1, 2), keepdims=True)
        var = ((h - mu) ** 2).mean(axis=(0, 1, 2), keepdims=True)
        return (h - mu) * jax.lax.rsqrt(var + EPS) * g + be

    h = jax.nn.relu(bn(conv(x, w1, b1), g1, be1))
    h2 = bn(conv(h, w2, b2), g2, be2)
    ident = x if wp is None else conv(x, wp)
    y = jax.nn.relu(h2 + ident)
    return jnp.transpose(y, (0, 3, 1, 2))


def _make_params(key, cin, cout, with_projection):
    ks = jax.random.split(key, 8)
    w1 = 0.1 * jax.random.normal(ks[0], (cout, cin, 3, 3), jnp.float32)
    b1 = 0.1 * jax.random.normal(ks[1], (cout,), jnp.float32)
    w2 = 0.1 * jax.random.normal(ks[2], (cout, cout, 3, 3), jnp.float32)
    b2 = 0.1 * jax.random.normal(ks[3], (cout,), jnp.float32)
    g1 = 1.0 + 0.1 * jax.random.normal(ks[4], (cout,), jnp.float32)
    be1 = 0.1 * jax.random.normal(ks[5], (cout,), jnp.float32)
    g2 = 1.0 + 0.1 * jax.random.normal(ks[6], (cout,), jnp.float32)
    be2 = 0.1 * jax.random.normal(ks[7], (cout,), jnp.float32)
    wp = (0.1 * jax.random.normal(ks[0], (cout, cin, 1, 1), jnp.float32)
          if with_projection else None)
    return (w1, b1, g1, be1, w2, b2, g2, be2, wp)


if __name__ == "__main__":
    key = jax.random.PRNGKey(0)
    k_x1, k_p1, k_x2, k_p2 = jax.random.split(key, 4)

    # bf16 MXU feeds + bf16 inter-pass activations vs f32 reference -> loose tol.
    ATOL = RTOL = 5e-2

    # Case 1: in_channels != out_channels -> 1x1 projection path
    N, Cin, Cout, H, W = 2, 4, 8, 16, 16
    x = jax.random.normal(k_x1, (N, Cin, H, W), jnp.float32)
    params = _make_params(k_p1, Cin, Cout, with_projection=True)
    out = jax.block_until_ready(residual_block(x, params))
    ref = jax.block_until_ready(residual_block_reference(x, params))
    assert out.shape == (N, Cout, H, W), out.shape
    assert jnp.allclose(out, ref, atol=ATOL, rtol=RTOL), \
        float(jnp.max(jnp.abs(out - ref)))

    # Case 2: in_channels == out_channels -> identity skip (no projection matmul)
    N2, C2, H2, W2 = 2, 8, 8, 8
    x2 = jax.random.normal(k_x2, (N2, C2, H2, W2), jnp.float32)
    params2 = _make_params(k_p2, C2, C2, with_projection=False)
    out2 = jax.block_until_ready(residual_block(x2, params2))
    ref2 = jax.block_until_ready(residual_block_reference(x2, params2))
    assert out2.shape == (N2, C2, H2, W2), out2.shape
    assert jnp.allclose(out2, ref2, atol=ATOL, rtol=RTOL), \
        float(jnp.max(jnp.abs(out2 - ref2)))

    print("KERNEL_OK")
</pallas_src>

<mosaic_0001>
module attributes {stable_mosaic.version = 11 : i64} {
  func.func @_conv1_kernel(%arg0: i32, %arg1: memref<1x16x16x4xf32, #tpu.memory_space<vmem>>, %arg2: memref<36x8xbf16, #tpu.memory_space<vmem>>, %arg3: memref<1x16x16x8xbf16, #tpu.memory_space<vmem>>, %arg4: memref<1x2x8xf32, #tpu.memory_space<vmem>>) attributes {dimension_semantics = [#tpu.dimension_semantics<parallel>], iteration_bounds = array<i64: 2>, scalar_prefetch = 0 : i64, scratch_operands = 0 : i64, tpu.core_type = #tpu.core_type<tc>, window_params = [{transform_indices = @transform_0, window_bounds = array<i64: 1, 16, 16, 4>}, {pipeline_mode = #tpu.pipeline_mode<synchronous>, transform_indices = @transform_1, window_bounds = array<i64: 36, 8>}, {transform_indices = @transform_2, window_bounds = array<i64: 1, 16, 16, 8>}, {transform_indices = @transform_3, window_bounds = array<i64: 1, 2, 8>}]} {
    %c0 = arith.constant 0 : index
    %c0_0 = arith.constant 0 : index
    %c0_1 = arith.constant 0 : index
    %c0_2 = arith.constant 0 : index
    %0 = vector.load %arg1[%c0, %c0_0, %c0_1, %c0_2] : memref<1x16x16x4xf32, #tpu.memory_space<vmem>>, vector<1x16x16x4xf32>
    %1 = vector.shape_cast %0 : vector<1x16x16x4xf32> to vector<16x16x4xf32>
    %cst = arith.constant 0.000000e+00 : f32
    %2 = vector.broadcast %cst : f32 to vector<1x16x4xf32>
    %cst_3 = arith.constant 0.000000e+00 : f32
    %3 = vector.broadcast %cst_3 : f32 to vector<18x1x4xf32>
    %4 = tpu.concatenate %2, %1, %2 in 0 : vector<1x16x4xf32>, vector<16x16x4xf32>, vector<1x16x4xf32> -> vector<18x16x4xf32>
    %5 = tpu.concatenate %3, %4, %3 in 1 : vector<18x1x4xf32>, vector<18x16x4xf32>, vector<18x1x4xf32> -> vector<18x18x4xf32>
    %c0_4 = arith.constant 0 : index
    %c0_5 = arith.constant 0 : index
    %6 = vector.load %arg2[%c0_4, %c0_5] : memref<36x8xbf16, #tpu.memory_space<vmem>>, vector<36x8xbf16>
    %7 = vector.extract_strided_slice %5 {offsets = [0, 0, 0], sizes = [18, 16, 4], strides = [1, 1, 1]} : vector<18x18x4xf32> to vector<18x16x4xf32>
    %8 = vector.extract_strided_slice %5 {offsets = [0, 1, 0], sizes = [18, 16, 4], strides = [1, 1, 1]} : vector<18x18x4xf32> to vector<18x16x4xf32>
    %9 = vector.extract_strided_slice %5 {offsets = [0, 2, 0], sizes = [18, 16, 4], strides = [1, 1, 1]} : vector<18x18x4xf32> to vector<18x16x4xf32>
    %10 = tpu.concatenate %7, %8, %9 in 2 : vector<18x16x4xf32>, vector<18x16x4xf32>, vector<18x16x4xf32> -> vector<18x16x12xf32>
    %11 = arith.truncf %10 : vector<18x16x12xf32> to vector<18x16x12xbf16>
    %12 = vector.extract_strided_slice %11 {offsets = [0, 0, 0], sizes = [16, 16, 12], strides = [1, 1, 1]} : vector<18x16x12xbf16> to vector<16x16x12xbf16>
    %13 = vector.shape_cast %12 : vector<16x16x12xbf16> to vector<256x12xbf16>
    %14 = vector.extract_strided_slice %6 {offsets = [0, 0], sizes = [12, 8], strides = [1, 1]} : vector<36x8xbf16> to vector<12x8xbf16>
    %cst_6 = arith.constant dense<0.000000e+00> : vector<256x8xf32>
    %15 = tpu.matmul %13, %14, %cst_6 {dimension_numbers = #tpu.dot_dimension_numbers<[1], [0], [0], [1], [0, 0, 1, 1], [], []>} : vector<256x12xbf16>, vector<12x8xbf16>, vector<256x8xf32> -> vector<256x8xf32>
    %16 = vector.extract_strided_slice %11 {offsets = [1, 0, 0], sizes = [16, 16, 12], strides = [1, 1, 1]} : vector<18x16x12xbf16> to vector<16x16x12xbf16>
    %17 = vector.shape_cast %16 : vector<16x16x12xbf16> to vector<256x12xbf16>
    %18 = vector.extract_strided_slice %6 {offsets = [12, 0], sizes = [12, 8], strides = [1, 1]} : vector<36x8xbf16> to vector<12x8xbf16>
    %cst_7 = arith.constant dense<0.000000e+00> : vector<256x8xf32>
    %19 = tpu.matmul %17, %18, %cst_7 {dimension_numbers = #tpu.dot_dimension_numbers<[1], [0], [0], [1], [0, 0, 1, 1], [], []>} : vector<256x12xbf16>, vector<12x8xbf16>, vector<256x8xf32> -> vector<256x8xf32>
    %20 = arith.addf %15, %19 : vector<256x8xf32>
    %21 = vector.extract_strided_slice %11 {offsets = [2, 0, 0], sizes = [16, 16, 12], strides = [1, 1, 1]} : vector<18x16x12xbf16> to vector<16x16x12xbf16>
    %22 = vector.shape_cast %21 : vector<16x16x12xbf16> to vector<256x12xbf16>
    %23 = vector.extract_strided_slice %6 {offsets = [24, 0], sizes = [12, 8], strides = [1, 1]} : vector<36x8xbf16> to vector<12x8xbf16>
    %cst_8 = arith.constant dense<0.000000e+00> : vector<256x8xf32>
    %24 = tpu.matmul %22, %23, %cst_8 {dimension_numbers = #tpu.dot_dimension_numbers<[1], [0], [0], [1], [0, 0, 1, 1], [], []>} : vector<256x12xbf16>, vector<12x8xbf16>, vector<256x8xf32> -> vector<256x8xf32>
    %25 = arith.addf %20, %24 : vector<256x8xf32>
    %cst_9 = arith.constant dense<0.000000e+00> : vector<8xf32>
    %26 = vector.multi_reduction <add>, %25, %cst_9 [0] : vector<256x8xf32> to vector<8xf32>
    %27 = vector.shape_cast %26 : vector<8xf32> to vector<1x8xf32>
    %28 = arith.mulf %25, %25 : vector<256x8xf32>
    %cst_10 = arith.constant dense<0.000000e+00> : vector<8xf32>
    %29 = vector.multi_reduction <add>, %28, %cst_10 [0] : vector<256x8xf32> to vector<8xf32>
    %30 = vector.shape_cast %29 : vector<8xf32> to vector<1x8xf32>
    %31 = tpu.concatenate %27, %30 in 0 : vector<1x8xf32>, vector<1x8xf32> -> vector<2x8xf32>
    %c0_11 = arith.constant 0 : index
    %c0_12 = arith.constant 0 : index
    %c0_13 = arith.constant 0 : index
    %32 = vector.load %arg4[%c0_11, %c0_12, %c0_13] : memref<1x2x8xf32, #tpu.memory_space<vmem>>, vector<1x2x8xf32>
    %33 = vector.shape_cast %32 : vector<1x2x8xf32> to vector<2x8xf32>
    %34 = vector.shape_cast %31 : vector<2x8xf32> to vector<1x2x8xf32>
    tpu.vector_store %arg4[%c0_11, %c0_12, %c0_13], %34 {strides = array<i32>} : memref<1x2x8xf32, #tpu.memory_space<vmem>>, vector<1x2x8xf32>,
    %35 = vector.shape_cast %25 : vector<256x8xf32> to vector<16x16x8xf32>
    %36 = arith.truncf %35 : vector<16x16x8xf32> to vector<16x16x8xbf16>
    %c0_14 = arith.constant 0 : index
    %c0_15 = arith.constant 0 : index
    %c0_16 = arith.constant 0 : index
    %c0_17 = arith.constant 0 : index
    %37 = vector.load %arg3[%c0_14, %c0_15, %c0_16, %c0_17] : memref<1x16x16x8xbf16, #tpu.memory_space<vmem>>, vector<1x16x16x8xbf16>
    %38 = vector.shape_cast %37 : vector<1x16x16x8xbf16> to vector<16x16x8xbf16>
    %39 = vector.shape_cast %36 : vector<16x16x8xbf16> to vector<1x16x16x8xbf16>
    tpu.vector_store %arg3[%c0_14, %c0_15, %c0_16, %c0_17], %39 {strides = array<i32>} : memref<1x16x16x8xbf16, #tpu.memory_space<vmem>>, vector<1x16x16x8xbf16>,
    return
  }
  func.func @transform_0(%arg0: i32) -> (i32, i32, i32, i32) {
    %c0_i32 = arith.constant 0 : i32
    %c0_i32_0 = arith.constant 0 : i32
    %c0_i32_1 = arith.constant 0 : i32
    %c0_i32_2 = arith.constant 0 : i32
    return %arg0, %c0_i32, %c0_i32_0, %c0_i32_1 : i32, i32, i32, i32
  }
  func.func @transform_1(%arg0: i32) -> (i32, i32) {
    %c0_i32 = arith.constant 0 : i32
    %c0_i32_0 = arith.constant 0 : i32
    %c0_i32_1 = arith.constant 0 : i32
    return %c0_i32, %c0_i32_0 : i32, i32
  }
  func.func @transform_2(%arg0: i32) -> (i32, i32, i32, i32) {
    %c0_i32 = arith.constant 0 : i32
    %c0_i32_0 = arith.constant 0 : i32
    %c0_i32_1 = arith.constant 0 : i32
    %c0_i32_2 = arith.constant 0 : i32
    return %arg0, %c0_i32, %c0_i32_0, %c0_i32_1 : i32, i32, i32, i32
  }
  func.func @transform_3(%arg0: i32) -> (i32, i32, i32) {
    %c0_i32 = arith.constant 0 : i32
    %c0_i32_0 = arith.constant 0 : i32
    %c0_i32_1 = arith.constant 0 : i32
    return %arg0, %c0_i32, %c0_i32_0 : i32, i32, i32
  }
}

</mosaic_0001>

<bundles_post_ra>
// kernel: tpu_custom_call.1
= control target key start
LH: loop header
LB: loop body
LE: loop exit
PB: predicated region body
PF: predicated region fallthrough
CT: control target
= control target key end

     0   :  { %9 = vsyncpa [#allocation3], 0  ;;  %s2988_s0 = inlined_call_operand.vmem [shape: f32[2,16,16,4], index: 0, kind: input, shape index: {}]   ;;  %s2989_s1 = inlined_call_operand.vmem [shape: bf16[36,8], index: 1, kind: input, shape index: {}]   ;;  %s2990_s2 = inlined_call_operand.vmem [shape: bf16[2,16,16,8], index: 2, kind: output, shape index: {0}]   ;;  %s2991_s3 = inlined_call_operand.hbm [shape: f32[2,2,8], index: 3, kind: output, shape index: {1}]  }
   0x1   :  { %11 = vsyncpa [#allocation3 + $0x1], 0  ;;  %s2088_s12 = smov 0   ;;  %s2090_s13 = smov 0  }
   0x2   :  { %s2092_s14 = smov 0   ;;  %s2094_s15 = smov 0  }
   0x3 LB: > { %s2109_s16 = sadd.s32 4294967295, %s2063_s15   ;;  %s1707_s17 = sadd.s32 4294967294, %s2063_s15   ;;  %s2063_s15 = sphi %s2094_s15, %s2997_s15   ;;  %s2059_s14 = sphi %s2092_s14, %s2996_s14   ;;  %s2055_s13 = sphi %s2090_s13, %s2995_s13   ;;  %s2051_s12 = sphi %s2088_s12, %s2994_s12  }
   0x4   : > { %s2113_s18 = sadd.s32 1, %s2063_s15   ;;  %s97_s19 = sadd.s32 1, %s2059_s14 }
   0x5   : > { %s94_s20 = ssub.s32 %s2063_s15, %s2113_s18  ;;  %p107_p0 = scmp.ne.s32.totalorder %s2059_s14, %s2055_s13 }
   0x6   : > { %p95_p1 = scmp.eq.s32.totalorder %s94_s20, 0  ;;  %p108_p2 = scmp.eq.s32.totalorder %s2109_s16, 1 }
   0x7   : > { %p113_p3 = scmp.ne.s32.totalorder %s2055_s13, %s2051_s12  ;;  %p114_p4 = scmp.eq.s32.totalorder %s1707_s17, 1 }
   0x8   : > { %s2124_s21 = scalar_select %p95_p1, %s2059_s14, %s97_s19  }
   0x9   : > { %p2126_p5 = por %p108_p2, %p107_p0  ;;  %p2130_p6 = por %p114_p4, %p113_p3 }
   0xa   : > { %p1710_p7 = scmp.ge.s32.totalorder %s2063_s15, 1  ;;  %p143_p8 = scmp.lt.s32.totalorder %s2063_s15, 3 }
   0xc   : > { %p144_p9 = pnand %p1710_p7, %p143_p8 }
   0xd   : > { %p172_p10 = scmp.lt.s32.totalorder (!%p144_p9), %s2109_s16, 1  ;;  %s2066_s29 = smov (!%p144_p9), 4  }
   0xe   : > { %147 = sbr.rel (%p144_p9) target bundleno = 521 (0x209), region = 28  ;;  %s2067_s30 = smov (!%p144_p9), 8  }
   0xf   : > { %s1769_s27 = sshll.u32 (!%p144_p9), %s2109_s16, 1  ;;  %s2021_s11 = scalar_lea.hbm (!%p144_p9), %s2991_s3, 4 }
  0x13   : > { %vm248_vm0 = vcmask 1040384   ;;  %v2065_v0 = vmov 0.0   ;;  %vm422_vm1 = vcmask 1046528   ;;  %s2140_s24 = scalar_select %p172_p10, %s2109_s16, 1  ;;  %vm610_vm2 = vcmask 1045504  }
  0x14   : > { %v2137_v1 = vrot.slane %v2065_v0, 7  ;;  %vm798_vm3 = vcmask 31744   ;;  %vm833_vm4 = vcmask 64512   ;;  %vm988_vm5 = vcmask 97280  }
  0x15   : > { %s1772_s25 = sshll.u32 %s2140_s24, 8  ;;  %s1773_s17 = sshll.u32 %s2140_s24, 7  ;;  %vm1566_vm6 = vcmask 60416   ;;  %vm1532_vm7 = vcmask 58368  }
  0x16   : > { %v2144_v2 = vsel %vm248_vm0, 0.0, %v2137_v1  ;;  %v366_v3 = vsel %vm248_vm0, %v2137_v1, 0.0  ;;  %v424_v4 = vrot.slane %v2137_v1, 1  ;;  %v612_v5 = vrot.slane %v2137_v1, 2  ;;  %s2156_s28 = scalar_lea.vmem %s2988_s0, %s1772_s25  ;;  %s2675_s25 = scalar_lea.vmem %s2990_s2, %s1773_s17 }
  0x17   : > { %v423_v6 = vrot.slane %v2144_v2, 1  ;;  %v426_v7 = vrot.slane %v366_v3, 1  ;;  %v611_v8 = vrot.slane %v2144_v2, 2  ;;  %v614_v9 = vrot.slane %v366_v3, 2  ;;  %v185_v12 = vld [vmem:[%s2156_s28 + $0x10] sm:$0xff]  ;;  %v186_v13 = vld [vmem:[%s2156_s28 + $0x18] sm:$0xff] }
  0x18   : > { %v183_v14 = vld [vmem:[%s2156_s28] sm:$0xff]  ;;  %v254_v18 = vrot.slane %v185_v12, 7  ;;  %v255_v19 = vrot.slane %v186_v13, 7  ;;  %v184_v20 = vld [vmem:[%s2156_s28 + $0x8] sm:$0xff]  ;;  %v190_v13 = vld [vmem:[%s2156_s28 + $0x38] sm:$0xff]  ;;  %s169_s24 = sand.u32 1, %s2055_s13  }
  0x19   : > { %v425_v10 = vsel %vm422_vm1, %v423_v6, %v424_v4  ;;  %v427_v11 = vsel %vm422_vm1, %v424_v4, %v426_v7  ;;  %v613_v15 = vsel %vm610_vm2, %v611_v8, %v612_v5  ;;  %v615_v16 = vsel %vm610_vm2, %v612_v5, %v614_v9  ;;  %v187_v22 = vld [vmem:[%s2156_s28 + $0x20] sm:$0xff]  ;;  %v188_v23 = vld [vmem:[%s2156_s28 + $0x28] sm:$0xff]  ;;  %v189_v5 = vld [vmem:[%s2156_s28 + $0x30] sm:$0xff]  ;;  %s1711_s26 = sshll.u32 %s169_s24, 1  ;;  %s1605_s16 = scalar_lea.sflag [#allocation3], %s169_s24 }
  0x1a   : > { %v1831_v17 = vpack.i.bf16 %v427_v11, %v425_v10  ;;  %v251_v21 = vrot.slane %v183_v14, 7  ;;  %v252_v24 = vrot.slane %v184_v20, 7  ;;  %v257_v25 = vrot.slane %v187_v22, 7  ;;  %v207_v48 = vld [vmem:[%s2156_s28 + $0xc0] sm:$0xff]  ;;  %v208_v49 = vld [vmem:[%s2156_s28 + $0xc8] sm:$0xff]  ;;  %v209_v14 = vld [vmem:[%s2156_s28 + $0xd0] sm:$0xff] }
  0x1b   : > { %v258_v26 = vrot.slane %v188_v23, 7  ;;  %v1851_v27 = vpack.i.bf16 %v615_v16, %v613_v15  ;;  %v2170_v28 = vsel %vm248_vm0, %v254_v18, %v255_v19  ;;  %v2173_v29 = vsel %vm248_vm0, 0.0, %v254_v18  ;;  %s171_s4 = scalar_lea.vmem [#allocation2], %s1711_s26 }
  0x1c   : > { %1832 = vrot.lane.b32.xlu1 %v1831_v17, %s2066_s29  ;;  %v368_v30 = vsel %vm248_vm0, %v255_v19, 0.0  ;;  %v2177_v31 = vsel %vm248_vm0, 0.0, %v251_v21  ;;  %v433_v32 = vrot.slane %v2173_v29, 1  ;;  %v434_v33 = vrot.slane %v2170_v28, 1  ;;  %v210_v19 = vld [vmem:[%s2156_s28 + $0xd8] sm:$0xff]  ;;  %s1620_s5 = sshll.u32 %s171_s4, 4  ;;  %s1621_s5 = int_to_ptr.vmem [resolvable:$true] %s1620_s5 }
  0x1d   : > { %v436_v34 = vrot.slane %v368_v30, 1  ;;  %v624_v35 = vrot.slane %v368_v30, 2  ;;  %1852 = vrot.lane.b32.xlu2 %v1851_v27, %s2067_s30  ;;  %v2183_v36 = vsel %vm248_vm0, %v251_v21, %v252_v24  ;;  %v367_v37 = vsel %vm248_vm0, %v252_v24, 0.0 }
  0x1e   : > { %v428_v38 = vrot.slane %v2177_v31, 1  ;;  %v621_v39 = vrot.slane %v2173_v29, 2  ;;  %v435_v40 = vsel %vm422_vm1, %v433_v32, %v434_v33  ;;  %v429_v42 = vrot.slane %v2183_v36, 1 }
  0x1f   : > { %v437_v41 = vsel %vm422_vm1, %v434_v33, %v436_v34  ;;  %v431_v43 = vrot.slane %v367_v37, 1  ;;  %v622_v45 = vrot.slane %v2170_v28, 2  ;;  %v2193_v46 = vsel %vm248_vm0, %v257_v25, %v258_v26 }
  0x20   : > { %v1836_v44 = vpack.i.bf16 %v437_v41, %v435_v40  ;;  %v2196_v47 = vsel %vm248_vm0, 0.0, %v257_v25  ;;  %v430_v50 = vsel %vm422_vm1, %v428_v38, %v429_v42  ;;  %v2203_v52 = vsel %vm248_vm0, %v258_v26, 0.0 }
  0x21   : > { %v432_v51 = vsel %vm422_vm1, %v429_v42, %v431_v43  ;;  %v623_v54 = vsel %vm610_vm2, %v621_v39, %v622_v45  ;;  %v625_v55 = vsel %vm610_vm2, %v622_v45, %v624_v35  ;;  %v438_v56 = vrot.slane %v2196_v47, 1  ;;  %v192_v45 = vld [vmem:[%s2156_s28 + $0x48] sm:$0xff] }
  0x22   : > { %1837 = vrot.lane.b32.xlu0 %v1836_v44, %s2066_s29  ;;  %v1846_v53 = vpack.i.bf16 %v432_v51, %v430_v50  ;;  %v439_v57 = vrot.slane %v2193_v46, 1  ;;  %v441_v58 = vrot.slane %v2203_v52, 1  ;;  %v287_v59 = vrot.slane %v207_v48, 7  ;;  %v191_v44 = vld [vmem:[%s2156_s28 + $0x40] sm:$0xff] }
  0x23   : > { %v288_v60 = vrot.slane %v208_v49, 7  ;;  %v616_v61 = vrot.slane %v2177_v31, 2  ;;  %v617_v62 = vrot.slane %v2183_v36, 2  ;;  %v619_v63 = vrot.slane %v367_v37, 2 }
  0x24   : > { %1847 = vrot.lane.b32.xlu1 %v1846_v53, %s2066_s29  ;;  %v2218_v3 = vsel %vm248_vm0, 0.0, %v287_v59  ;;  %v1841_v6 = vpack.i.bf16 %v625_v55, %v623_v54  ;;  %v440_v10 = vsel %vm422_vm1, %v438_v56, %v439_v57  ;;  %v442_v11 = vsel %vm422_vm1, %v439_v57, %v441_v58  ;;  %v211_v55 = vld [vmem:[%s2156_s28 + $0xe0] sm:$0xff] }
  0x25   : > { %v2215_v0 = vsel %vm248_vm0, %v287_v59, %v288_v60  ;;  %v379_v4 = vsel %vm248_vm0, %v288_v60, 0.0  ;;  %v488_v7 = vrot.slane %v2218_v3, 1  ;;  %v618_v12 = vsel %vm610_vm2, %v616_v61, %v617_v62  ;;  %v212_v60 = vld [vmem:[%s2156_s28 + $0xe8] sm:$0xff] }
  0x26   : > { %v489_v8 = vrot.slane %v2215_v0, 1  ;;  %v491_v9 = vrot.slane %v379_v4, 1  ;;  %v620_v17 = vsel %vm610_vm2, %v617_v62, %v619_v63  ;;  %v260_v18 = vrot.slane %v189_v5, 7 }
  0x27   : > { %v1856_v21 = vpack.i.bf16 %v620_v17, %v618_v12  ;;  %v261_v22 = vrot.slane %v190_v13, 7  ;;  %v290_v24 = vrot.slane %v209_v14, 7  ;;  %v1861_v25 = vpack.i.bf16 %v442_v11, %v440_v10 }
  0x28   : > { %v490_v15 = vsel %vm422_vm1, %v488_v7, %v489_v8  ;;  %v492_v16 = vsel %vm422_vm1, %v489_v8, %v491_v9  ;;  %v2235_v23 = vsel %vm248_vm0, 0.0, %v260_v18  ;;  %v291_v27 = vrot.slane %v210_v19, 7 }
  0x29   : > { %v1866_v20 = vpack.i.bf16 %v492_v16, %v490_v15  ;;  %1857 = vrot.lane.b32.xlu2 %v1856_v21, %s2067_s30  ;;  %v443_v26 = vrot.slane %v2235_v23, 1  ;;  %v2241_v30 = vsel %vm248_vm0, %v260_v18, %v261_v22  ;;  %v370_v32 = vsel %vm248_vm0, %v261_v22, 0.0 }
  0x2a   : > { %1842 = vrot.lane.b32.xlu0 %v1841_v6, %s2067_s30  ;;  %v626_v33 = vrot.slane %v2196_v47, 2  ;;  %v627_v34 = vrot.slane %v2193_v46, 2  ;;  %v676_v35 = vrot.slane %v2218_v3, 2  ;;  %v444_v37 = vrot.slane %v2241_v30, 1 }
  0x2b   : > { %v446_v38 = vrot.slane %v370_v32, 1  ;;  %v2249_v39 = vsel %vm248_vm0, 0.0, %v290_v24  ;;  %v677_v40 = vrot.slane %v2215_v0, 2  ;;  %v679_v41 = vrot.slane %v379_v4, 2 }
  0x2c   : > { %1867 = vrot.lane.b32.xlu1 %v1866_v20, %s2066_s29  ;;  %v2253_v42 = vsel %vm248_vm0, %v290_v24, %v291_v27  ;;  %v380_v43 = vsel %vm248_vm0, %v291_v27, 0.0  ;;  %v445_v48 = vsel %vm422_vm1, %v443_v26, %v444_v37  ;;  %v681_v51 = vrot.slane %v2249_v39, 2  ;;  %v213_v26 = vld [vmem:[%s2156_s28 + $0xf0] sm:$0xff]  ;;  %v214_v27 = vld [vmem:[%s2156_s28 + $0xf8] sm:$0xff] }
  0x2d   : > { %v447_v49 = vsel %vm422_vm1, %v444_v37, %v446_v38  ;;  %v682_v53 = vrot.slane %v2253_v42, 2  ;;  %v628_v54 = vsel %vm610_vm2, %v626_v33, %v627_v34  ;;  %v684_v56 = vrot.slane %v380_v43, 2 }
  0x2e   : > { %v1881_v50 = vpack.i.bf16 %v447_v49, %v445_v48  ;;  %v629_v57 = vrot.slane %v2203_v52, 2  ;;  %v263_v58 = vrot.slane %v191_v44, 7  ;;  %v264_v59 = vrot.slane %v192_v45, 7  ;;  %v194_v45 = vld [vmem:[%s2156_s28 + $0x58] sm:$0xff] }
  0x2f   : > { %v678_v61 = vsel %vm610_vm2, %v676_v35, %v677_v40  ;;  %v680_v62 = vsel %vm610_vm2, %v677_v40, %v679_v41  ;;  %v293_v6 = vrot.slane %v211_v55, 7  ;;  %v631_v52 = vrot.slane %v2235_v23, 2  ;;  %v193_v41 = vld [vmem:[%s2156_s28 + $0x50] sm:$0xff] }
  0x30   : > { %v630_v63 = vsel %vm610_vm2, %v627_v34, %v629_v57  ;;  %v2271_v4 = vsel %vm248_vm0, %v263_v58, %v264_v59  ;;  %v2274_v5 = vsel %vm248_vm0, 0.0, %v263_v58  ;;  %v632_v7 = vrot.slane %v2241_v30, 2 }
  0x31   : > { %v1871_v8 = vpack.i.bf16 %v630_v63, %v628_v54  ;;  %v294_v9 = vrot.slane %v212_v60, 7  ;;  %v683_v10 = vsel %vm610_vm2, %v681_v51, %v682_v53  ;;  %v685_v11 = vsel %vm610_vm2, %v682_v53, %v684_v56 }
  0x32   : > { %1862 = vrot.lane.b32.xlu0 %v1861_v25, %s2066_s29  ;;  %v371_v12 = vsel %vm248_vm0, %v264_v59, 0.0  ;;  %v493_v13 = vrot.slane %v2249_v39, 1  ;;  %v1876_v14 = vpack.i.bf16 %v680_v62, %v678_v61  ;;  %v634_v15 = vrot.slane %v370_v32, 2 }
  0x33   : > { %1872 = vrot.lane.b32.xlu2 %v1871_v8, %s2067_s30  ;;  %v636_v16 = vrot.slane %v2274_v5, 2  ;;  %v637_v17 = vrot.slane %v2271_v4, 2  ;;  %v2287_v18 = vsel %vm248_vm0, 0.0, %v293_v6  ;;  %v494_v19 = vrot.slane %v2253_v42, 1  ;;  %v196_v8 = vld [vmem:[%s2156_s28 + $0x68] sm:$0xff] }
  0x34   : > { %1882 = vrot.lane.b32.xlu1 %v1881_v50, %s2066_s29  ;;  %v496_v20 = vrot.slane %v380_v43, 1  ;;  %v1896_v21 = vpack.i.bf16 %v685_v11, %v683_v10  ;;  %v639_v22 = vrot.slane %v371_v12, 2  ;;  %v2291_v24 = vsel %vm248_vm0, %v293_v6, %v294_v9 }
  0x35   : > { %v2294_v25 = vsel %vm248_vm0, %v294_v9, 0.0  ;;  %v633_v32 = vsel %vm610_vm2, %v631_v52, %v632_v7  ;;  %v495_v33 = vsel %vm422_vm1, %v493_v13, %v494_v19  ;;  %v635_v35 = vsel %vm610_vm2, %v632_v7, %v634_v15  ;;  %v195_v7 = vld [vmem:[%s2156_s28 + $0x60] sm:$0xff] }
  0x36   : > { %v497_v34 = vsel %vm422_vm1, %v494_v19, %v496_v20  ;;  %v638_v37 = vsel %vm610_vm2, %v636_v16, %v637_v17  ;;  %v498_v38 = vrot.slane %v2287_v18, 1  ;;  %v499_v43 = vrot.slane %v2291_v24, 1 }
  0x37   : > { %v1886_v40 = vpack.i.bf16 %v497_v34, %v495_v33  ;;  %v501_v44 = vrot.slane %v2294_v25, 1  ;;  %v296_v48 = vrot.slane %v213_v26, 7  ;;  %v297_v49 = vrot.slane %v214_v27, 7 }
  0x38   : > { %v640_v50 = vsel %vm610_vm2, %v637_v17, %v639_v22  ;;  %v448_v51 = vrot.slane %v2274_v5, 1  ;;  %v449_v53 = vrot.slane %v2271_v4, 1  ;;  %v451_v54 = vrot.slane %v371_v12, 1 }
  0x39   : > { %v1891_v55 = vpack.i.bf16 %v635_v35, %v633_v32  ;;  %v266_v56 = vrot.slane %v193_v41, 7  ;;  %v267_v57 = vrot.slane %v194_v45, 7  ;;  %v2315_v58 = vsel %vm248_vm0, %v296_v48, %v297_v49  ;;  %v205_v41 = vld [vmem:[%s2156_s28 + $0xb0] sm:$0xff] }
  0x3a   : > { %1877 = vrot.lane.b32.xlu0 %v1876_v14, %s2067_s30  ;;  %v2318_v59 = vsel %vm248_vm0, 0.0, %v296_v48  ;;  %v2321_v60 = vsel %vm248_vm0, %v297_v49, 0.0  ;;  %v1911_v61 = vpack.i.bf16 %v640_v50, %v638_v37  ;;  %v500_v62 = vsel %vm422_vm1, %v498_v38, %v499_v43 }
  0x3b   : > { %1887 = vrot.lane.b32.xlu2 %v1886_v40, %s2066_s29  ;;  %v502_v63 = vsel %vm422_vm1, %v499_v43, %v501_v44  ;;  %v450_v6 = vsel %vm422_vm1, %v448_v51, %v449_v53  ;;  %v452_v52 = vsel %vm422_vm1, %v449_v53, %v451_v54  ;;  %v2330_v9 = vsel %vm248_vm0, 0.0, %v266_v56  ;;  %v206_v43 = vld [vmem:[%s2156_s28 + $0xb8] sm:$0xff] }
  0x3c   : > { %1897 = vrot.lane.b32.xlu1 %v1896_v21, %s2067_s30  ;;  %v503_v10 = vrot.slane %v2318_v59, 1  ;;  %v504_v11 = vrot.slane %v2315_v58, 1  ;;  %v506_v12 = vrot.slane %v2321_v60, 1  ;;  %v2337_v13 = vsel %vm248_vm0, %v266_v56, %v267_v57 }
  0x3d   : > { %v372_v14 = vsel %vm248_vm0, %v267_v57, 0.0  ;;  %v1901_v15 = vpack.i.bf16 %v452_v52, %v450_v6  ;;  %v686_v16 = vrot.slane %v2287_v18, 2  ;;  %v687_v17 = vrot.slane %v2291_v24, 2 }
  0x3e   : > { %v689_v19 = vrot.slane %v2294_v25, 2  ;;  %v269_v20 = vrot.slane %v195_v7, 7  ;;  %v270_v21 = vrot.slane %v196_v8, 7  ;;  %v1906_v22 = vpack.i.bf16 %v502_v63, %v500_v62 }
  0x3f   : > { %v453_v26 = vrot.slane %v2330_v9, 1  ;;  %v454_v27 = vrot.slane %v2337_v13, 1  ;;  %v505_v32 = vsel %vm422_vm1, %v503_v10, %v504_v11  ;;  %v507_v33 = vsel %vm422_vm1, %v504_v11, %v506_v12 }
  0x40   : > { %v456_v34 = vrot.slane %v372_v14, 1  ;;  %v2350_v25 = vsel %vm248_vm0, %v269_v20, %v270_v21  ;;  %v2353_v35 = vsel %vm248_vm0, 0.0, %v269_v20  ;;  %v373_v37 = vsel %vm248_vm0, %v270_v21, 0.0 }
  0x41   : > { %v688_v38 = vsel %vm610_vm2, %v686_v16, %v687_v17  ;;  %v690_v40 = vsel %vm610_vm2, %v687_v17, %v689_v19  ;;  %v1926_v44 = vpack.i.bf16 %v507_v33, %v505_v32  ;;  %v455_v45 = vsel %vm422_vm1, %v453_v26, %v454_v27  ;;  %v197_v32 = vld [vmem:[%s2156_s28 + $0x70] sm:$0xff]  ;;  %v198_v33 = vld [vmem:[%s2156_s28 + $0x78] sm:$0xff] }
  0x42   : > { %1892 = vrot.lane.b32.xlu0 %v1891_v55, %s2067_s30  ;;  %v458_v48 = vrot.slane %v2353_v35, 1  ;;  %v459_v49 = vrot.slane %v2350_v25, 1  ;;  %v461_v50 = vrot.slane %v373_v37, 1  ;;  %v457_v51 = vsel %vm422_vm1, %v454_v27, %v456_v34 }
  0x43   : > { %1902 = vrot.lane.b32.xlu2 %v1901_v15, %s2066_s29  ;;  %v1916_v53 = vpack.i.bf16 %v690_v40, %v688_v38  ;;  %v284_v54 = vrot.slane %v205_v41, 7  ;;  %v285_v55 = vrot.slane %v206_v43, 7  ;;  %v641_v56 = vrot.slane %v2330_v9, 2 }
  0x44   : > { %1912 = vrot.lane.b32.xlu1 %v1911_v61, %s2067_s30  ;;  %v642_v57 = vrot.slane %v2337_v13, 2  ;;  %v644_v61 = vrot.slane %v372_v14, 2  ;;  %v1921_v62 = vpack.i.bf16 %v457_v51, %v455_v45  ;;  %v460_v63 = vsel %vm422_vm1, %v458_v48, %v459_v49 }
  0x45   : > { %v462_v6 = vsel %vm422_vm1, %v459_v49, %v461_v50  ;;  %v691_v52 = vrot.slane %v2318_v59, 2  ;;  %v2373_v7 = vsel %vm248_vm0, %v284_v54, %v285_v55  ;;  %v2376_v8 = vsel %vm248_vm0, 0.0, %v284_v54 }
  0x46   : > { %v378_v10 = vsel %vm248_vm0, %v285_v55, 0.0  ;;  %v692_v11 = vrot.slane %v2315_v58, 2  ;;  %v694_v12 = vrot.slane %v2321_v60, 2  ;;  %v643_v14 = vsel %vm610_vm2, %v641_v56, %v642_v57 }
  0x47   : > { %v645_v15 = vsel %vm610_vm2, %v642_v57, %v644_v61  ;;  %v1941_v16 = vpack.i.bf16 %v462_v6, %v460_v63  ;;  %v671_v17 = vrot.slane %v2376_v8, 2  ;;  %v672_v19 = vrot.slane %v2373_v7, 2 }
  0x48   : > { %v674_v20 = vrot.slane %v378_v10, 2  ;;  %v1931_v21 = vpack.i.bf16 %v645_v15, %v643_v14  ;;  %v695_v26 = vsel %vm610_vm2, %v692_v11, %v694_v12  ;;  %v646_v38 = vrot.slane %v2353_v35, 2  ;;  %v199_v15 = vld [vmem:[%s2156_s28 + $0x80] sm:$0xff] }
  0x49   : > { %v673_v60 = vsel %vm610_vm2, %v671_v17, %v672_v19  ;;  %v647_v40 = vrot.slane %v2350_v25, 2  ;;  %v649_v41 = vrot.slane %v373_v37, 2  ;;  %v273_v45 = vrot.slane %v198_v33, 7 }
  0x4a   : > { %1907 = vrot.lane.b32.xlu0 %v1906_v22, %s2066_s29  ;;  %v693_v22 = vsel %vm610_vm2, %v691_v52, %v692_v11  ;;  %v675_v27 = vsel %vm610_vm2, %v672_v19, %v674_v20  ;;  %v483_v63 = vrot.slane %v2376_v8, 1  ;;  %v484_v6 = vrot.slane %v2373_v7, 1  ;;  %v1776_v20 = vld [vmem:[%s2989_s1] sm:$0xff]  }
  0x4b   : > { %1917 = vrot.lane.b32.xlu2 %v1916_v53, %s2067_s30  ;;  %v1936_v34 = vpack.i.bf16 %v695_v26, %v693_v22  ;;  %v1956_v43 = vpack.i.bf16 %v675_v27, %v673_v60  ;;  %v648_v48 = vsel %vm610_vm2, %v646_v38, %v647_v40  ;;  %v650_v49 = vsel %vm610_vm2, %v647_v40, %v649_v41  ;;  %v1788_v40 = vld [vmem:[%s2989_s1 + $0x4] sm:$0xff] }
  0x4c   : > { %1927 = vrot.lane.b32.xlu1 %v1926_v44, %s2066_s29  ;;  %v272_v44 = vrot.slane %v197_v32, 7  ;;  %v374_v53 = vsel %vm248_vm0, %v273_v45, 0.0  ;;  %v1951_v37 = vpack.i.bf16 %v650_v49, %v648_v48  ;;  %v486_v52 = vrot.slane %v378_v10, 1 }
  0x4d   : > { %v654_v56 = vrot.slane %v374_v53, 2  ;;  %v485_v11 = vsel %vm422_vm1, %v483_v63, %v484_v6  ;;  %v275_v17 = vrot.slane %v199_v15, 7  ;;  %v1141_v26 = vsel %vm610_vm2, %v1776_v20, 0 }
  0x4e   : > { %v2401_v50 = vsel %vm248_vm0, %v272_v44, %v273_v45  ;;  %v2404_v51 = vsel %vm248_vm0, 0.0, %v272_v44  ;;  %v487_v12 = vsel %vm422_vm1, %v484_v6, %v486_v52  ;;  %1150 = vmatpush.bf16.msra.mxu1 %v1141_v26  ;;  %v987_v41 = vrot.slane %v1788_v40, 2 }
  0x4f   : > { %v651_v54 = vrot.slane %v2404_v51, 2  ;;  %v652_v55 = vrot.slane %v2401_v50, 2  ;;  %v1946_v14 = vpack.i.bf16 %v487_v12, %v485_v11  ;;  %v2427_v10 = vsel %vm248_vm0, 0.0, %v275_v17 }
  0x50   : > { %v468_v60 = vrot.slane %v2427_v10, 1  ;;  %v464_v44 = vrot.slane %v2401_v50, 1  ;;  %v466_v45 = vrot.slane %v374_v53, 1  ;;  %v1038_v48 = vsel %vm610_vm2, %v987_v41, 0  ;;  %v201_v53 = vld [vmem:[%s2156_s28 + $0x90] sm:$0xff] }
  0x51   : > { %v653_v57 = vsel %vm610_vm2, %v651_v54, %v652_v55  ;;  %v655_v61 = vsel %vm610_vm2, %v652_v55, %v654_v56  ;;  %1047 = vmatpush.bf16.msra.mxu0 %v1038_v48  ;;  %1784 = vmatpush.bf16.msra.mxu3 %v1038_v48  ;;  %v1750_v55 = vld [vmem:[%s2989_s1 + $0xc] sm:$0xf]  ;;  %v1774_v56 = vld [vmem:[%s2989_s1 + $0xc] sm:$0x30] }
  0x52   : > { %1922 = vrot.lane.b32.xlu0 %v1921_v62, %s2066_s29  ;;  %v1966_v62 = vpack.i.bf16 %v655_v61, %v653_v57  ;;  %v1751_v57 = vor.u32 %v1774_v56, %v1750_v55  ;;  %v202_v61 = vld [vmem:[%s2156_s28 + $0x98] sm:$0xff] }
  0x53   : > { %1932 = vrot.lane.b32.xlu2 %v1931_v21, %s2067_s30  ;;  %v279_v63 = vrot.slane %v202_v61, 7 }
  0x54   : > { %1942 = vrot.lane.b32.xlu1 %v1941_v16, %s2066_s29  ;;  %v200_v16 = vld [vmem:[%s2156_s28 + $0x88] sm:$0xff]  ;;  %v2457_v6 = vsel %vm610_vm2, %v1751_v57, 0 }
  0x55   : > { %v276_v19 = vrot.slane %v200_v16, 7  ;;  %1785 = vmatpush.bf16.msrb.mxu3 %v1141_v26  ;;  %1247 = vmatpush.bf16.msra.mxu2 %v2457_v6  ;;  %v376_v12 = vsel %vm248_vm0, %v279_v63, 0.0 }
  0x56   : > { %v476_v16 = vrot.slane %v376_v12, 1 }
  0x57   : > { %v2424_v21 = vsel %vm248_vm0, %v275_v17, %v276_v19  ;;  %v2430_v22 = vsel %vm248_vm0, %v276_v19, 0.0 }
  0x58   : > { %v469_v27 = vrot.slane %v2424_v21, 1  ;;  %v471_v32 = vrot.slane %v2430_v22, 1  ;;  %v659_v48 = vrot.slane %v2430_v22, 2  ;;  %v203_v22 = vld [vmem:[%s2156_s28 + $0xa0] sm:$0xff] }
  0x5a   : > { %1937 = vrot.lane.b32.xlu0 %v1936_v34, %s2067_s30  ;;  %v470_v33 = vsel %vm422_vm1, %v468_v60, %v469_v27  ;;  %v472_v34 = vsel %vm422_vm1, %v469_v27, %v471_v32  ;;  %v664_v60 = vrot.slane %v376_v12, 2  ;;  %v204_v12 = vld [vmem:[%s2156_s28 + $0xa8] sm:$0xff] }
  0x5b   : > { %1947 = vrot.lane.b32.xlu2 %v1946_v14, %s2066_s29  ;;  %v1971_v38 = vpack.i.bf16 %v472_v34, %v470_v33 }
  0x5c   : > { %1957 = vrot.lane.b32.xlu1 %v1956_v43, %s2067_s30  ;;  %v463_v43 = vrot.slane %v2404_v51, 1 }
  0x5e   : > { %v465_v49 = vsel %vm422_vm1, %v463_v43, %v464_v44 }
  0x62   : > { %1952 = vrot.lane.b32.xlu0 %v1951_v37, %s2067_s30  ;;  %v467_v37 = vsel %vm422_vm1, %v464_v44, %v466_v45  ;;  %v656_v44 = vrot.slane %v2427_v10, 2  ;;  %v657_v45 = vrot.slane %v2424_v21, 2 }
  0x63   : > { %v1961_v54 = vpack.i.bf16 %v467_v37, %v465_v49 }
  0x64   : > { %1972 = vrot.lane.b32.xlu1 %v1971_v38, %s2066_s29  ;;  %v660_v55 = vsel %vm610_vm2, %v657_v45, %v659_v48 }
  0x65   : > { %1962 = vrot.lane.b32.xlu2 %v1961_v54, %s2066_s29  ;;  %v658_v54 = vsel %vm610_vm2, %v656_v44, %v657_v45 }
  0x6a   : > { %1967 = vrot.lane.b32.xlu0 %v1966_v62, %s2067_s30  ;;  %v278_v62 = vrot.slane %v201_v53, 7 }
  0x6c   : > { %v2461_v52 = vsel %vm248_vm0, %v278_v62, %v279_v63  ;;  %v2464_v11 = vsel %vm248_vm0, 0.0, %v278_v62  ;;  %v1976_v63 = vpack.i.bf16 %v660_v55, %v658_v54 }
  0x6d   : > { %v473_v14 = vrot.slane %v2464_v11, 1  ;;  %v474_v15 = vrot.slane %v2461_v52, 1  ;;  %v661_v17 = vrot.slane %v2464_v11, 2  ;;  %v662_v19 = vrot.slane %v2461_v52, 2 }
  0x6e   : > { %1977 = vrot.lane.b32.xlu2 %v1976_v63, %s2067_s30 }
  0x6f   : > { %v475_v20 = vsel %vm422_vm1, %v473_v14, %v474_v15  ;;  %v477_v26 = vsel %vm422_vm1, %v474_v15, %v476_v16  ;;  %v663_v33 = vsel %vm610_vm2, %v661_v17, %v662_v19  ;;  %v665_v34 = vsel %vm610_vm2, %v662_v19, %v664_v60 }
  0x70   : > { %v1981_v32 = vpack.i.bf16 %v477_v26, %v475_v20  ;;  %v1986_v38 = vpack.i.bf16 %v665_v34, %v663_v33  ;;  %v281_v16 = vrot.slane %v203_v22, 7  ;;  %v282_v17 = vrot.slane %v204_v12, 7 }
  0x72   : > { %1982 = vrot.lane.b32.xlu0 %v1981_v32, %s2066_s29  ;;  %1987 = vrot.lane.b32.xlu1 %v1986_v38, %s2067_s30  ;;  %v2495_v32 = vsel %vm248_vm0, 0.0, %v281_v16  ;;  %v2498_v33 = vsel %vm248_vm0, %v282_v17, 0.0 }
  0x73   : > { %v669_v44 = vrot.slane %v2498_v33, 2 }
  0x77   : > { %v1853_v27 = vpop.permute.xlu2 %1852 }
  0x78   : > { %v1855_v40 = vunpack.i.h.bf16 %v1853_v27  ;;  %v1854_v43 = vunpack.i.l.bf16 %v1853_v27  ;;  %v2492_v27 = vsel %vm248_vm0, %v281_v16, %v282_v17 }
  0x83   : > { %v1858_v62 = vpop.permute.xlu2 %1857 }
  0x84   : > { %v1860_v20 = vunpack.i.h.bf16 %v1858_v62 }
  0x8e   : > { %v1833_v41 = vpop.permute.xlu1 %1832 }
  0x8f   : > { %v1835_v49 = vunpack.i.h.bf16 %v1833_v41  ;;  %v1834_v37 = vunpack.i.l.bf16 %v1833_v41  ;;  %v666_v41 = vrot.slane %v2495_v32, 2 }
  0x91   : > { %v800_v56 = vsel %vm798_vm3, %v2137_v1, %v1835_v49  ;;  %v799_v57 = vsel %vm798_vm3, %v2144_v2, %v1834_v37  ;;  %v1859_v2 = vunpack.i.l.bf16 %v1858_v62 }
  0x92   : > { %v834_v53 = vsel %vm833_vm4, %v799_v57, %v1854_v43  ;;  %v835_v61 = vsel %vm833_vm4, %v800_v56, %v1855_v40  ;;  %v667_v43 = vrot.slane %v2492_v27, 2 }
  0x93   : > { %v868_v14 = vpack.c.bf16 %v834_v53, %v834_v53  ;;  %v869_v15 = vpack.c.bf16 %v835_v61, %v835_v61 }
  0x94   : > { %v1838_v19 = vpop.permute.xlu0 %1837  ;;  %v668_v56 = vsel %vm610_vm2, %v666_v41, %v667_v43  ;;  %v670_v57 = vsel %vm610_vm2, %v667_v43, %v669_v44 }
  0x95   : > { %v1131_v1 = vunpack.c.l.b16 %v868_v14  ;;  %v1132_v26 = vunpack.c.l.b16 %v869_v15  ;;  %v1840_v45 = vunpack.i.h.bf16 %v1838_v19  ;;  %v1839_v48 = vunpack.i.l.bf16 %v1838_v19 }
  0x96   : > { %v1848_v60 = vpop.permute.xlu1 %1847  ;;  %v1996_v62 = vpack.i.bf16 %v670_v57, %v668_v56  ;;  %v478_v57 = vrot.slane %v2495_v32, 1 }
  0x97   : > { %v1850_v34 = vunpack.i.h.bf16 %v1848_v60  ;;  %v1849_v38 = vunpack.i.l.bf16 %v1848_v60  ;;  %v2500_v40 = vpack.c.b16 %v1132_v26, %v1131_v1  ;;  %v803_v15 = vsel %vm798_vm3, %v2173_v29, %v1839_v48  ;;  %v1873_v60 = vpop.permute.xlu2 %1872 }
  0x98   : > { %1997 = vrot.lane.b32.xlu0 %v1996_v62, %s2067_s30  ;;  %v1875_v44 = vunpack.i.h.bf16 %v1873_v60  ;;  %v1874_v29 = vunpack.i.l.bf16 %v1873_v60  ;;  %s1618_s30 = scalar_lea.hbm %s2991_s3, %s1769_s27 }
  0x99   : > { %v802_v49 = vsel %vm798_vm3, %v2183_v36, %v1850_v34  ;;  %v801_v37 = vsel %vm798_vm3, %v2177_v31, %v1849_v38  ;;  %1732 = vmatmul.msk.bf16.vlgmr.msra.gmra.mxu1 %vm988_vm5, %v2500_v40  ;;  %v804_v31 = vsel %vm798_vm3, %v2170_v28, %v1840_v45  ;;  %s1622_s6 = sshll.u32 %s1618_s30, 4  ;;  %s1623_s6 = int_to_ptr.hbm [resolvable:$true] %s1622_s6 }
  0x9a   : > { %v836_v54 = vsel %vm833_vm4, %v801_v37, %v1859_v2  ;;  %v837_v55 = vsel %vm833_vm4, %v802_v49, %v1860_v20  ;;  %s2015_s7 = sshra.s32 %s1623_s6, 4  ;;  %s2016_s7 = int_to_ptr.hbm [resolvable:$true] %s2015_s7 }
  0x9b   : > { %v870_v53 = vpack.c.bf16 %v836_v54, %v836_v54  ;;  %v871_v61 = vpack.c.bf16 %v837_v55, %v837_v55  ;;  %s2017_s8 = scalar_lea.hbm %s2016_s7, 2  ;;  %p2022_p0 = scmp.lt.s32.totalorder %s2016_s7, %s2991_s3 }
  0x9c   : > { %v1843_v63 = vpop.permute.xlu0 %1842  ;;  %p2018_p11 = scmp.ne.s32.totalorder %s2016_s7, %s2017_s8  ;;  %p2023_p1 = scmp.lt.s32.totalorder %s2021_s11, %s2017_s8 }
  0x9d   : > { %v1845_v22 = vunpack.i.h.bf16 %v1843_v63  ;;  %v1844_v36 = vunpack.i.l.bf16 %v1843_v63  ;;  %v934_v12 = vunpack.c.l.b16 %v870_v53  ;;  %v935_v14 = vunpack.c.l.b16 %v871_v61 }
  0x9e   : > { %v1868_v16 = vpop.permute.xlu1 %1867  ;;  %v479_v53 = vrot.slane %v2492_v27, 1  ;;  %v481_v61 = vrot.slane %v2498_v33, 1  ;;  %p2019_p12 = pnand %p2018_p11, %p2126_p5  ;;  %p2024_p2 = por %p2023_p1, %p2022_p0 }
  0x9f   : > { %v838_v17 = vsel %vm833_vm4, %v803_v15, %v1844_v36  ;;  %v839_v19 = vsel %vm833_vm4, %v804_v31, %v1845_v22  ;;  %v966_v20 = vpack.c.b16 %v935_v14, %v934_v12  ;;  %v1870_v37 = vunpack.i.h.bf16 %v1868_v16  ;;  %v1888_v36 = vpop.permute.xlu2 %1887 }
  0xa0   : > { %v872_v1 = vpack.c.bf16 %v838_v17, %v838_v17  ;;  %v873_v26 = vpack.c.bf16 %v839_v19, %v839_v19  ;;  %v1869_v54 = vunpack.i.l.bf16 %v1868_v16  ;;  %v480_v12 = vsel %vm422_vm1, %v478_v57, %v479_v53  ;;  %p2020_p13 = pneg %p2019_p12 }
  0xa1   : > { %1716 = vmatmul.msk.bf16.vlgmr.msra.gmra.mxu0 %vm988_vm5, %v966_v20  ;;  %v482_v14 = vsel %vm422_vm1, %v479_v53, %v481_v61  ;;  %v1890_v19 = vunpack.i.h.bf16 %v1888_v36 }
  0xa2   : > { %v936_v2 = vunpack.c.l.b16 %v872_v1  ;;  %v937_v34 = vunpack.c.l.b16 %v873_v26  ;;  %v1991_v16 = vpack.i.bf16 %v482_v14, %v480_v12  ;;  %p2025_p3 = pnand %p2024_p2, %p2020_p13 }
  0xa4   : > { %v1863_v38 = vpop.permute.xlu0 %1862  ;;  %v2523_v41 = vpack.c.b16 %v937_v34, %v936_v2  ;;  %1992 = vrot.lane.b32.xlu2 %v1991_v16, %s2066_s29 }
  0xa5   : > { %v1865_v28 = vunpack.i.h.bf16 %v1863_v38  ;;  %v1864_v43 = vunpack.i.l.bf16 %v1863_v38 }
  0xa6   : > { %1752 = vmatmul.msk.bf16.vlgmr.msra.gmra.mxu2 %vm988_vm5, %v2523_v41  ;;  %v1883_v45 = vpop.permute.xlu1 %1882 }
  0xa7   : > { %v806_v48 = vsel %vm798_vm3, %v2193_v46, %v1865_v28  ;;  %v805_v49 = vsel %vm798_vm3, %v2196_v47, %v1864_v43  ;;  %v826_v46 = vsel %vm798_vm3, %v2215_v0, %v1870_v37  ;;  %v825_v47 = vsel %vm798_vm3, %v2218_v3, %v1869_v54  ;;  %v1903_v53 = vpop.permute.xlu2 %1902 }
  0xa8   : > { %v841_v55 = vsel %vm833_vm4, %v806_v48, %v1875_v44  ;;  %v840_v56 = vsel %vm833_vm4, %v805_v49, %v1874_v29  ;;  %v1889_v0 = vunpack.i.l.bf16 %v1888_v36  ;;  %v1885_v2 = vunpack.i.h.bf16 %v1883_v45 }
  0xa9   : > { %1733 = vmatmul.msk.bf16.gmra.mxu1 %vm988_vm5, %v966_v20  ;;  %v874_v63 = vpack.c.bf16 %v840_v56, %v840_v56  ;;  %v875_v22 = vpack.c.bf16 %v841_v55, %v841_v55  ;;  %v1884_v34 = vunpack.i.l.bf16 %v1883_v45  ;;  %v828_v37 = vsel %vm798_vm3, %v2253_v42, %v1890_v19 }
  0xaa   : > { %v827_v54 = vsel %vm798_vm3, %v2249_v39, %v1889_v0  ;;  %v808_v57 = vsel %vm798_vm3, %v2241_v30, %v1885_v2 }
  0xab   : > { %v938_v1 = vunpack.c.l.b16 %v874_v63  ;;  %v939_v26 = vunpack.c.l.b16 %v875_v22  ;;  %v807_v45 = vsel %vm798_vm3, %v2235_v23, %v1884_v34 }
  0xac   : > { %v1878_v62 = vpop.permute.xlu0 %1877 }
  0xad   : > { %v1880_v31 = vunpack.i.h.bf16 %v1878_v62  ;;  %v1879_v15 = vunpack.i.l.bf16 %v1878_v62  ;;  %v968_v49 = vpack.c.b16 %v939_v26, %v938_v1 }
  0xae   : > { %v1898_v60 = vpop.permute.xlu1 %1897 }
  0xaf   : > { %v860_v17 = vsel %vm833_vm4, %v825_v47, %v1879_v15  ;;  %v861_v33 = vsel %vm833_vm4, %v826_v46, %v1880_v31  ;;  %v1900_v43 = vunpack.i.h.bf16 %v1898_v60  ;;  %v1899_v44 = vunpack.i.l.bf16 %v1898_v60  ;;  %v1918_v16 = vpop.permute.xlu2 %1917 }
  0xb0   : > { %v894_v3 = vpack.c.bf16 %v860_v17, %v860_v17  ;;  %v895_v20 = vpack.c.bf16 %v861_v33, %v861_v33  ;;  %v1904_v17 = vunpack.i.l.bf16 %v1903_v53  ;;  %v1919_v0 = vunpack.i.l.bf16 %v1918_v16 }
  0xb1   : > { %1717 = vmatmul.msk.bf16.gmra.mxu0 %vm988_vm5, %v2523_v41  ;;  %v863_v61 = vsel %vm833_vm4, %v828_v37, %v1900_v43  ;;  %v862_v42 = vsel %vm833_vm4, %v827_v54, %v1899_v44 }
  0xb2   : > { %v958_v38 = vunpack.c.l.b16 %v894_v3  ;;  %v959_v28 = vunpack.c.l.b16 %v895_v20  ;;  %v896_v23 = vpack.c.bf16 %v862_v42, %v862_v42  ;;  %v897_v30 = vpack.c.bf16 %v863_v61, %v863_v61 }
  0xb3   : > { %v809_v34 = vsel %vm798_vm3, %v2274_v5, %v1904_v17 }
  0xb4   : > { %v1893_v29 = vpop.permute.xlu0 %1892  ;;  %v2548_v48 = vpack.c.b16 %v959_v28, %v958_v38  ;;  %v960_v22 = vunpack.c.l.b16 %v896_v23  ;;  %v961_v36 = vunpack.c.l.b16 %v897_v30 }
  0xb5   : > { %v1895_v55 = vunpack.i.h.bf16 %v1893_v29  ;;  %v1894_v56 = vunpack.i.l.bf16 %v1893_v29 }
  0xb6   : > { %1728 = vmatmul.msk.bf16.vlgmr.msra.gmra.mxu3 %vm988_vm5, %v2548_v48  ;;  %1753 = vmatmul.msk.bf16.gmra.mxu2 %vm988_vm5, %v968_v49  ;;  %v1913_v33 = vpop.permute.xlu1 %1912  ;;  %v2569_v19 = vpack.c.b16 %v961_v36, %v960_v22 }
  0xb7   : > { %1786 = vmatpush.bf16.msra.mxu3 %v2457_v6  ;;  %v842_v39 = vsel %vm833_vm4, %v807_v45, %v1894_v56  ;;  %v843_v46 = vsel %vm833_vm4, %v808_v57, %v1895_v55  ;;  %v1905_v6 = vunpack.i.h.bf16 %v1903_v53  ;;  %v1915_v26 = vunpack.i.h.bf16 %v1913_v33 }
  0xb8   : > { %v876_v47 = vpack.c.bf16 %v842_v39, %v842_v39  ;;  %v877_v62 = vpack.c.bf16 %v843_v46, %v843_v46  ;;  %v1914_v60 = vunpack.i.l.bf16 %v1913_v33  ;;  %v1933_v46 = vpop.permute.xlu2 %1932 }
  0xb9   : > { %1734 = vmatmul.msk.bf16.gmra.mxu1 %vm988_vm5, %v2523_v41  ;;  %v1920_v41 = vunpack.i.h.bf16 %v1918_v16  ;;  %v810_v2 = vsel %vm798_vm3, %v2271_v4, %v1905_v6  ;;  %v1935_v22 = vunpack.i.h.bf16 %v1933_v46  ;;  %v1934_v36 = vunpack.i.l.bf16 %v1933_v46 }
  0xba   : > { %v940_v12 = vunpack.c.l.b16 %v876_v47  ;;  %v941_v14 = vunpack.c.l.b16 %v877_v62  ;;  %v844_v43 = vsel %vm833_vm4, %v809_v34, %v1914_v60 }
  0xbb   : > { %v878_v29 = vpack.c.bf16 %v844_v43, %v844_v43 }
  0xbc   : > { %v1908_v63 = vpop.permute.xlu0 %1907  ;;  %v969_v3 = vpack.c.b16 %v941_v14, %v940_v12 }
  0xbd   : > { %v1910_v31 = vunpack.i.h.bf16 %v1908_v63  ;;  %v1909_v15 = vunpack.i.l.bf16 %v1908_v63  ;;  %v942_v56 = vunpack.c.l.b16 %v878_v29 }
  0xbe   : > { %v1928_v37 = vpop.permute.xlu1 %1927 }
  0xbf   : > { %v830_v20 = vsel %vm798_vm3, %v2291_v24, %v1910_v31  ;;  %v829_v1 = vsel %vm798_vm3, %v2287_v18, %v1909_v15  ;;  %v845_v18 = vsel %vm833_vm4, %v810_v2, %v1915_v26  ;;  %v1930_v45 = vunpack.i.h.bf16 %v1928_v37 }
  0xc0   : > { %v865_v28 = vsel %vm833_vm4, %v830_v20, %v1920_v41  ;;  %v864_v24 = vsel %vm833_vm4, %v829_v1, %v1919_v0  ;;  %v879_v5 = vpack.c.bf16 %v845_v18, %v845_v18  ;;  %v1929_v53 = vunpack.i.l.bf16 %v1928_v37  ;;  %v1948_v33 = vpop.permute.xlu2 %1947 }
  0xc1   : > { %1718 = vmatmul.msk.bf16.gmra.mxu0 %vm988_vm5, %v968_v49  ;;  %v898_v4 = vpack.c.bf16 %v864_v24, %v864_v24  ;;  %v899_v44 = vpack.c.bf16 %v865_v28, %v865_v28  ;;  %v832_v62 = vsel %vm798_vm3, %v2315_v58, %v1930_v45  ;;  %v1950_v26 = vunpack.i.h.bf16 %v1948_v33 }
  0xc2   : > { %v943_v57 = vunpack.c.l.b16 %v879_v5  ;;  %v831_v63 = vsel %vm798_vm3, %v2318_v59, %v1929_v53  ;;  %v1949_v60 = vunpack.i.l.bf16 %v1948_v33 }
  0xc3   : > { %v962_v54 = vunpack.c.l.b16 %v898_v4  ;;  %v963_v55 = vunpack.c.l.b16 %v899_v44  ;;  %v824_v4 = vsel %vm798_vm3, %v2373_v7, %v1950_v26 }
  0xc4   : > { %v1923_v38 = vpop.permute.xlu0 %1922  ;;  %v970_v47 = vpack.c.b16 %v943_v57, %v942_v56  ;;  %v823_v44 = vsel %vm798_vm3, %v2376_v8, %v1949_v60 }
  0xc5   : > { %v1925_v42 = vunpack.i.h.bf16 %v1923_v38  ;;  %v1924_v39 = vunpack.i.l.bf16 %v1923_v38  ;;  %v2588_v23 = vpack.c.b16 %v963_v55, %v962_v54 }
  0xc6   : > { %1729 = vmatmul.msk.bf16.gmra.mxu3 %vm988_vm5, %v2569_v19  ;;  %1754 = vmatmul.msk.bf16.gmra.mxu2 %vm988_vm5, %v969_v3  ;;  %v1943_v31 = vpop.permute.xlu1 %1942 }
  0xc7   : > { %v812_v12 = vsel %vm798_vm3, %v2337_v13, %v1925_v42  ;;  %v811_v14 = vsel %vm798_vm3, %v2330_v9, %v1924_v39  ;;  %v1945_v34 = vunpack.i.h.bf16 %v1943_v31  ;;  %v1944_v38 = vunpack.i.l.bf16 %v1943_v31 }
  0xc8   : > { %v847_v59 = vsel %vm833_vm4, %v812_v12, %v1935_v22  ;;  %v846_v16 = vsel %vm833_vm4, %v811_v14, %v1934_v36 }
  0xc9   : > { %1735 = vmatmul.msk.bf16.gmra.mxu1 %vm988_vm5, %v968_v49  ;;  %v880_v17 = vpack.c.bf16 %v846_v16, %v846_v16  ;;  %v881_v9 = vpack.c.bf16 %v847_v59, %v847_v59  ;;  %v814_v37 = vsel %vm798_vm3, %v2350_v25, %v1945_v34  ;;  %v813_v54 = vsel %vm798_vm3, %v2353_v35, %v1944_v38  ;;  %v1963_v35 = vpop.permute.xlu2 %1962 }
  0xcb   : > { %v944_v20 = vunpack.c.l.b16 %v880_v17  ;;  %v945_v1 = vunpack.c.l.b16 %v881_v9 }
  0xcc   : > { %v1938_v61 = vpop.permute.xlu0 %1937 }
  0xcd   : > { %v1940_v49 = vunpack.i.h.bf16 %v1938_v61  ;;  %v1939_v30 = vunpack.i.l.bf16 %v1938_v61  ;;  %v971_v43 = vpack.c.b16 %v945_v1, %v944_v20 }
  0xce   : > { %v1958_v2 = vpop.permute.xlu1 %1957 }
  0xcf   : > { %v866_v15 = vsel %vm833_vm4, %v831_v63, %v1939_v30  ;;  %v867_v58 = vsel %vm833_vm4, %v832_v62, %v1940_v49  ;;  %v1959_v18 = vunpack.i.l.bf16 %v1958_v2  ;;  %v1965_v49 = vunpack.i.h.bf16 %v1963_v35 }
  0xd0   : > { %v900_v13 = vpack.c.bf16 %v866_v15, %v866_v15  ;;  %v901_v6 = vpack.c.bf16 %v867_v58, %v867_v58  ;;  %v1964_v30 = vunpack.i.l.bf16 %v1963_v35 }
  0xd1   : > { %1719 = vmatmul.msk.bf16.gmra.mxu0 %vm988_vm5, %v969_v3  ;;  %v858_v7 = vsel %vm833_vm4, %v823_v44, %v1959_v18  ;;  %v1978_v9 = vpop.permute.xlu2 %1977 }
  0xd2   : > { %v964_v41 = vunpack.c.l.b16 %v900_v13  ;;  %v965_v0 = vunpack.c.l.b16 %v901_v6  ;;  %v892_v25 = vpack.c.bf16 %v858_v7, %v858_v7  ;;  %v815_v14 = vsel %vm798_vm3, %v2404_v51, %v1964_v30 }
  0xd3   : > { %v1980_v33 = vunpack.i.h.bf16 %v1978_v9 }
  0xd4   : > { %v1953_v28 = vpop.permute.xlu0 %1952  ;;  %v2607_v24 = vpack.c.b16 %v965_v0, %v964_v41  ;;  %v956_v42 = vunpack.c.l.b16 %v892_v25  ;;  %v1979_v41 = vunpack.i.l.bf16 %v1978_v9 }
  0xd5   : > { %v1955_v29 = vunpack.i.h.bf16 %v1953_v28  ;;  %v1954_v5 = vunpack.i.l.bf16 %v1953_v28 }
  0xd6   : > { %1730 = vmatmul.msk.bf16.gmra.mxu3 %vm988_vm5, %v2588_v23  ;;  %1755 = vmatmul.msk.bf16.gmra.mxu2 %vm988_vm5, %v970_v47  ;;  %v1973_v16 = vpop.permute.xlu1 %1972 }
  0xd7   : > { %v848_v56 = vsel %vm833_vm4, %v813_v54, %v1954_v5  ;;  %v849_v8 = vsel %vm833_vm4, %v814_v37, %v1955_v29  ;;  %v1974_v17 = vunpack.i.l.bf16 %v1973_v16 }
  0xd8   : > { %v882_v45 = vpack.c.bf16 %v848_v56, %v848_v56  ;;  %v883_v53 = vpack.c.bf16 %v849_v8, %v849_v8 }
  0xd9   : > { %1736 = vmatmul.msk.bf16.gmra.mxu1 %vm988_vm5, %v969_v3  ;;  %v1960_v3 = vunpack.i.h.bf16 %v1958_v2  ;;  %v817_v20 = vsel %vm798_vm3, %v2427_v10, %v1974_v17 }
  0xda   : > { %v946_v39 = vunpack.c.l.b16 %v882_v45  ;;  %v947_v46 = vunpack.c.l.b16 %v883_v53  ;;  %v852_v1 = vsel %vm833_vm4, %v817_v20, %v1979_v41 }
  0xdb   : > { %v859_v55 = vsel %vm833_vm4, %v824_v4, %v1960_v3  ;;  %v886_v60 = vpack.c.bf16 %v852_v1, %v852_v1 }
  0xdc   : > { %v893_v57 = vpack.c.bf16 %v859_v55, %v859_v55  ;;  %v1968_v62 = vpop.permute.xlu0 %1967  ;;  %v972_v12 = vpack.c.b16 %v947_v46, %v946_v39 }
  0xdd   : > { %v1970_v22 = vunpack.i.h.bf16 %v1968_v62  ;;  %v1969_v36 = vunpack.i.l.bf16 %v1968_v62  ;;  %v950_v38 = vunpack.c.l.b16 %v886_v60 }
  0xde   : > { %v957_v61 = vunpack.c.l.b16 %v893_v57 }
  0xdf   : > { %v850_v31 = vsel %vm833_vm4, %v815_v14, %v1969_v36 }
  0xe0   : > { %v2626_v63 = vpack.c.b16 %v957_v61, %v956_v42  ;;  %v884_v58 = vpack.c.bf16 %v850_v31, %v850_v31 }
  0xe1   : > { %1720 = vmatmul.msk.bf16.gmra.mxu0 %vm988_vm5, %v970_v47 }
  0xe2   : > { %v948_v13 = vunpack.c.l.b16 %v884_v58 }
  0xe4   : > { %v1983_v34 = vpop.permute.xlu0 %1982  ;;  %v1988_v18 = vpop.permute.xlu1 %1987 }
  0xe5   : > { %v1984_v3 = vunpack.i.l.bf16 %v1983_v34  ;;  %v1989_v4 = vunpack.i.l.bf16 %v1988_v18 }
  0xe6   : > { %1731 = vmatmul.msk.bf16.gmra.mxu3 %vm988_vm5, %v2607_v24  ;;  %1756 = vmatmul.msk.bf16.gmra.mxu2 %vm988_vm5, %v971_v43 }
  0xe7   : > { %v819_v29 = vsel %vm798_vm3, %v2464_v11, %v1984_v3 }
  0xe8   : > { %v854_v54 = vsel %vm833_vm4, %v819_v29, %v1989_v4 }
  0xe9   : > { %1737 = vmatmul.msk.bf16.gmra.mxu1 %vm988_vm5, %v970_v47  ;;  %v816_v47 = vsel %vm798_vm3, %v2401_v50, %v1965_v49  ;;  %v1975_v50 = vunpack.i.h.bf16 %v1973_v16  ;;  %v888_v7 = vpack.c.bf16 %v854_v54, %v854_v54 }
  0xea   : > { %v851_v15 = vsel %vm833_vm4, %v816_v47, %v1970_v22 }
  0xeb   : > { %v885_v59 = vpack.c.bf16 %v851_v15, %v851_v15  ;;  %v818_v0 = vsel %vm798_vm3, %v2424_v21, %v1975_v50  ;;  %v1985_v21 = vunpack.i.h.bf16 %v1983_v34 }
  0xec   : > { %v853_v26 = vsel %vm833_vm4, %v818_v0, %v1980_v33 }
  0xed   : > { %v949_v6 = vunpack.c.l.b16 %v885_v59  ;;  %v887_v2 = vpack.c.bf16 %v853_v26, %v853_v26  ;;  %v820_v44 = vsel %vm798_vm3, %v2461_v52, %v1985_v21  ;;  %v952_v52 = vunpack.c.l.b16 %v888_v7 }
  0xef   : > { %v973_v51 = vpack.c.b16 %v949_v6, %v948_v13  ;;  %v951_v28 = vunpack.c.l.b16 %v887_v2 }
  0xf1   : > { %1721 = vmatmul.msk.bf16.gmra.mxu0 %vm988_vm5, %v971_v43  ;;  %v974_v10 = vpack.c.b16 %v951_v28, %v950_v38 }
  0xf6   : > { %1744 = vmatmul.msk.bf16.vlgmr.msrb.gmra.mxu3 %vm988_vm5, %v2626_v63  ;;  %1757 = vmatmul.msk.bf16.gmra.mxu2 %vm988_vm5, %v972_v12 }
  0xf9   : > { %1738 = vmatmul.msk.bf16.gmra.mxu1 %vm988_vm5, %v971_v43  ;;  %v1990_v43 = vunpack.i.h.bf16 %v1988_v18 }
  0xfb   : > { %v855_v37 = vsel %vm833_vm4, %v820_v44, %v1990_v43 }
  0xfc   : > { %v889_v55 = vpack.c.bf16 %v855_v37, %v855_v37 }
  0xfe   : > { %v1993_v56 = vpop.permute.xlu2 %1992  ;;  %v953_v8 = vunpack.c.l.b16 %v889_v55 }
  0xff   : > { %v1995_v11 = vunpack.i.h.bf16 %v1993_v56  ;;  %v1994_v45 = vunpack.i.l.bf16 %v1993_v56 }
 0x100   : > { %v975_v35 = vpack.c.b16 %v953_v8, %v952_v52 }
 0x101   : > { %1722 = vmatmul.msk.bf16.gmra.mxu0 %vm988_vm5, %v972_v12  ;;  %v822_v39 = vsel %vm798_vm3, %v2492_v27, %v1995_v11  ;;  %v821_v46 = vsel %vm798_vm3, %v2495_v32, %v1994_v45 }
 0x106   : > { %1745 = vmatmul.msk.bf16.gmra.mxu3 %vm988_vm5, %v2548_v48  ;;  %1758 = vmatmul.msk.bf16.gmra.mxu2 %vm988_vm5, %v973_v51 }
 0x109   : > { %1739 = vmatmul.msk.bf16.gmra.mxu1 %vm988_vm5, %v972_v12 }
 0x10a   : > { %v1998_v53 = vpop.permute.xlu0 %1997 }
 0x10b   : > { %v2000_v61 = vunpack.i.h.bf16 %v1998_v53  ;;  %v1999_v42 = vunpack.i.l.bf16 %v1998_v53 }
 0x10d   : > { %v856_v62 = vsel %vm833_vm4, %v821_v46, %v1999_v42  ;;  %v857_v22 = vsel %vm833_vm4, %v822_v39, %v2000_v61 }
 0x10e   : > { %v890_v47 = vpack.c.bf16 %v856_v62, %v856_v62  ;;  %v891_v14 = vpack.c.bf16 %v857_v22, %v857_v22 }
 0x110   : > { %v954_v31 = vunpack.c.l.b16 %v890_v47  ;;  %v955_v15 = vunpack.c.l.b16 %v891_v14 }
 0x111   : > { %1723 = vmatmul.msk.bf16.gmra.mxu0 %vm988_vm5, %v973_v51 }
 0x112   : > { %v976_v17 = vpack.c.b16 %v955_v15, %v954_v31 }
 0x116   : > { %1746 = vmatmul.msk.bf16.gmra.mxu3 %vm988_vm5, %v2569_v19  ;;  %1759 = vmatmul.msk.bf16.gmra.mxu2 %vm988_vm5, %v974_v10  ;;  %v1152_v5 = vpop.f32.mrf.mxu1 }
 0x119   : > { %1740 = vmatmul.msk.bf16.gmra.mxu1 %vm988_vm5, %v973_v51 }
 0x11e   : > { %v1049_v57 = vpop.f32.mrf.mxu0  ;;  %v1154_v25 = vpop.f32.mrf.mxu1 }
 0x11f   : > { %v1153_v36 = vadd.f32 %v1152_v5, %v1049_v57 }
 0x121   : > { %1724 = vmatmul.msk.bf16.gmra.mxu0 %vm988_vm5, %v974_v10 }
 0x126   : > { %v1051_v49 = vpop.f32.mrf.mxu0  ;;  %1747 = vmatmul.msk.bf16.gmra.mxu3 %vm988_vm5, %v2588_v23  ;;  %1760 = vmatmul.msk.bf16.gmra.mxu2 %vm988_vm5, %v975_v35  ;;  %v1157_v30 = vpop.f32.mrf.mxu1 }
 0x127   : > { %v1155_v16 = vadd.f32 %v1154_v25, %v1051_v49 }
 0x129   : > { %v1249_v12 = vpop.f32.mrf.mxu2  ;;  %1741 = vmatmul.msk.bf16.gmra.mxu1 %vm988_vm5, %v974_v10 }
 0x12a   : > { %v1329_v27 = vadd.f32 %v1249_v12, %v1153_v36 }
 0x12c   : > { %v1534_v32 = vpack.c.bf16 %v1329_v27, %v1329_v27  ;;  %v1430_v6 = vmul.f32 %v1329_v27, %v1329_v27  ;;  %v1361_v9 = vsel %vm833_vm4, %v1329_v27, 0.0 }
 0x12e   : > { %1567 = vst.msk [vmem:[%s2675_s25] sm:$0xf] %vm1566_vm6, %v1534_v32  ;;  %v1054_v58 = vpop.f32.mrf.mxu0  ;;  %v1159_v59 = vpop.f32.mrf.mxu1  ;;  %v1462_v20 = vsel %vm833_vm4, %v1430_v6, 0.0 }
 0x12f   : > { %v1158_v34 = vadd.f32 %v1157_v30, %v1054_v58 }
 0x131   : > { %1725 = vmatmul.msk.bf16.gmra.mxu0 %vm988_vm5, %v975_v35  ;;  %v1251_v13 = vpop.f32.mrf.mxu2 }
 0x132   : > { %v1330_v50 = vadd.f32 %v1251_v13, %v1155_v16 }
 0x134   : > { %v1362_v51 = vsel %vm833_vm4, %v1330_v50, 0.0  ;;  %v1431_v33 = vmul.f32 %v1330_v50, %v1330_v50  ;;  %v1535_v41 = vpack.c.bf16 %v1330_v50, %v1330_v50 }
 0x135   : > { %v1363_v0 = vadd.f32 %v1362_v51, %v1361_v9 }
 0x136   : > { %v1463_v1 = vsel %vm833_vm4, %v1431_v33, 0.0  ;;  %1568 = vst.msk [vmem:[%s2675_s25 + $0x4] sm:$0xf] %vm1566_vm6, %v1535_v41  ;;  %v1056_v26 = vpop.f32.mrf.mxu0  ;;  %1761 = vmatmul.msk.bf16.gmra.mxu2 %vm988_vm5, %v976_v17  ;;  %1764 = vmatmul.msk.bf16.vlgmr.msra.gmra.mxu3 %vm988_vm5, %v2569_v19  ;;  %v1162_v2 = vpop.f32.mrf.mxu1 }
 0x137   : > { %v1464_v60 = vadd.f32 %v1463_v1, %v1462_v20  ;;  %v1160_v5 = vadd.f32 %v1159_v59, %v1056_v26 }
 0x139   : > { %v2689_v38 = vpop.f32.mrf.mxu3  ;;  %v1254_v28 = vpop.f32.mrf.mxu2  ;;  %1742 = vmatmul.msk.bf16.gmra.mxu1 %vm988_vm5, %v975_v35 }
 0x13a   : > { %v1331_v21 = vadd.f32 %v1254_v28, %v1158_v34 }
 0x13c   : > { %v1364_v3 = vsel %vm833_vm4, %v1331_v21, 0.0  ;;  %v1432_v18 = vmul.f32 %v1331_v21, %v1331_v21  ;;  %v1536_v10 = vpack.c.bf16 %v1331_v21, %v1331_v21 }
 0x13d   : > { %v1365_v43 = vadd.f32 %v1364_v3, %v1363_v0 }
 0x13e   : > { %v1465_v4 = vsel %vm833_vm4, %v1432_v18, 0.0  ;;  %1569 = vst.msk [vmem:[%s2675_s25 + $0x8] sm:$0xf] %vm1566_vm6, %v1536_v10  ;;  %v1059_v19 = vpop.f32.mrf.mxu0  ;;  %v1164_v29 = vpop.f32.mrf.mxu1 }
 0x13f   : > { %v1466_v44 = vadd.f32 %v1465_v4, %v1464_v60  ;;  %v1163_v53 = vadd.f32 %v1162_v2, %v1059_v19 }
 0x141   : > { %1726 = vmatmul.msk.bf16.gmra.mxu0 %vm988_vm5, %v976_v17  ;;  %v2697_v37 = vpop.f32.mrf.mxu3  ;;  %v1256_v54 = vpop.f32.mrf.mxu2 }
 0x142   : > { %v1332_v55 = vadd.f32 %v1256_v54, %v1160_v5 }
 0x144   : > { %v1366_v7 = vsel %vm833_vm4, %v1332_v55, 0.0  ;;  %v1433_v56 = vmul.f32 %v1332_v55, %v1332_v55  ;;  %v1537_v8 = vpack.c.bf16 %v1332_v55, %v1332_v55 }
 0x145   : > { %v1367_v52 = vadd.f32 %v1366_v7, %v1365_v43 }
 0x146   : > { %v1467_v57 = vsel %vm833_vm4, %v1433_v56, 0.0  ;;  %1570 = vst.msk [vmem:[%s2675_s25 + $0xc] sm:$0xf] %vm1566_vm6, %v1537_v8  ;;  %v1061_v25 = vpop.f32.mrf.mxu0  ;;  %1762 = vmatmul.msk.bf16.gmra.mxu2 %vm988_vm5, %v2626_v63  ;;  %1765 = vmatmul.msk.bf16.gmra.mxu3 %vm988_vm5, %v2588_v23  ;;  %v1167_v45 = vpop.f32.mrf.mxu1 }
 0x147   : > { %v1468_v11 = vadd.f32 %v1467_v57, %v1466_v44  ;;  %v1165_v12 = vadd.f32 %v1164_v29, %v1061_v25 }
 0x149   : > { %v2707_v35 = vpop.f32.mrf.mxu3  ;;  %v1259_v61 = vpop.f32.mrf.mxu2  ;;  %1743 = vmatmul.msk.bf16.gmra.mxu1 %vm988_vm5, %v976_v17 }
 0x14a   : > { %v1333_v42 = vadd.f32 %v1259_v61, %v1163_v53 }
 0x14c   : > { %v1368_v39 = vsel %vm833_vm4, %v1333_v42, 0.0  ;;  %v1434_v46 = vmul.f32 %v1333_v42, %v1333_v42  ;;  %v1538_v49 = vpack.c.bf16 %v1333_v42, %v1333_v42 }
 0x14d   : > { %v1369_v30 = vadd.f32 %v1368_v39, %v1367_v52 }
 0x14e   : > { %v1469_v62 = vsel %vm833_vm4, %v1434_v46, 0.0  ;;  %1571 = vst.msk [vmem:[%s2675_s25 + $0x10] sm:$0xf] %vm1566_vm6, %v1538_v49  ;;  %v1064_v23 = vpop.f32.mrf.mxu0  ;;  %v1169_v36 = vpop.f32.mrf.mxu1 }
 0x14f   : > { %v1470_v22 = vadd.f32 %v1469_v62, %v1468_v11  ;;  %v1168_v6 = vadd.f32 %v1167_v45, %v1064_v23 }
 0x151   : > { %1727 = vmatmul.msk.bf16.gmra.mxu0 %vm988_vm5, %v2626_v63  ;;  %v2716_v27 = vpop.f32.mrf.mxu3  ;;  %v1261_v47 = vpop.f32.mrf.mxu2 }
 0x152   : > { %v1334_v14 = vadd.f32 %v1261_v47, %v1165_v12 }
 0x154   : > { %v1370_v32 = vsel %vm833_vm4, %v1334_v14, 0.0  ;;  %v1435_v31 = vmul.f32 %v1334_v14, %v1334_v14  ;;  %v1539_v15 = vpack.c.bf16 %v1334_v14, %v1334_v14 }
 0x155   : > { %v1371_v58 = vadd.f32 %v1370_v32, %v1369_v30 }
 0x156   : > { %v1471_v59 = vsel %vm833_vm4, %v1435_v31, 0.0  ;;  %1572 = vst.msk [vmem:[%s2675_s25 + $0x14] sm:$0xf] %vm1566_vm6, %v1539_v15  ;;  %v1066_v16 = vpop.f32.mrf.mxu0  ;;  %1763 = vmatmul.msk.bf16.gmra.mxu2 %vm988_vm5, %v2548_v48  ;;  %1766 = vmatmul.msk.bf16.gmra.mxu3 %vm988_vm5, %v2607_v24  ;;  %v1172_v13 = vpop.f32.mrf.mxu1 }
 0x157   : > { %v1472_v63 = vadd.f32 %v1471_v59, %v1470_v22  ;;  %v1170_v26 = vadd.f32 %v1169_v36, %v1066_v16 }
 0x159   : > { %v2726_v50 = vpop.f32.mrf.mxu3  ;;  %v1264_v17 = vpop.f32.mrf.mxu2 }
 0x15a   : > { %v1335_v9 = vadd.f32 %v1264_v17, %v1168_v6 }
 0x15c   : > { %v1372_v51 = vsel %vm833_vm4, %v1335_v9, 0.0  ;;  %v1436_v33 = vmul.f32 %v1335_v9, %v1335_v9  ;;  %v1540_v41 = vpack.c.bf16 %v1335_v9, %v1335_v9 }
 0x15d   : > { %v1373_v0 = vadd.f32 %v1372_v51, %v1371_v58 }
 0x15e   : > { %v1473_v20 = vsel %vm833_vm4, %v1436_v33, 0.0  ;;  %1573 = vst.msk [vmem:[%s2675_s25 + $0x18] sm:$0xf] %vm1566_vm6, %v1540_v41  ;;  %v1069_v48 = vpop.f32.mrf.mxu0  ;;  %v1174_v24 = vpop.f32.mrf.mxu1 }
 0x15f   : > { %v1474_v1 = vadd.f32 %v1473_v20, %v1472_v63  ;;  %v1173_v44 = vadd.f32 %v1172_v13, %v1069_v48 }
 0x161   : > { %v2732_v60 = vpop.f32.mrf.mxu3  ;;  %v1266_v2 = vpop.f32.mrf.mxu2 }
 0x162   : > { %v1336_v34 = vadd.f32 %v1266_v2, %v1170_v26 }
 0x164   : > { %v1374_v28 = vsel %vm833_vm4, %v1336_v34, 0.0  ;;  %v1437_v21 = vmul.f32 %v1336_v34, %v1336_v34  ;;  %v1541_v3 = vpack.c.bf16 %v1336_v34, %v1336_v34 }
 0x165   : > { %v1375_v18 = vadd.f32 %v1374_v28, %v1373_v0 }
 0x166   : > { %v1475_v10 = vsel %vm833_vm4, %v1437_v21, 0.0  ;;  %1574 = vst.msk [vmem:[%s2675_s25 + $0x1c] sm:$0xf] %vm1566_vm6, %v1541_v3  ;;  %v1071_v43 = vpop.f32.mrf.mxu0  ;;  %1767 = vmatmul.msk.bf16.gmra.mxu3 %vm988_vm5, %v2500_v40  ;;  %v1177_v19 = vpop.f32.mrf.mxu1 }
 0x167   : > { %v1476_v4 = vadd.f32 %v1475_v10, %v1474_v1  ;;  %v1175_v11 = vadd.f32 %v1174_v24, %v1071_v43 }
 0x169   : > { %v2740_v29 = vpop.f32.mrf.mxu3  ;;  %v1269_v5 = vpop.f32.mrf.mxu2 }
 0x16a   : > { %v1337_v54 = vadd.f32 %v1269_v5, %v1173_v44 }
 0x16c   : > { %v1376_v55 = vsel %vm833_vm4, %v1337_v54, 0.0  ;;  %v1438_v7 = vmul.f32 %v1337_v54, %v1337_v54  ;;  %v1542_v56 = vpack.c.bf16 %v1337_v54, %v1337_v54 }
 0x16d   : > { %v1377_v8 = vadd.f32 %v1376_v55, %v1375_v18 }
 0x16e   : > { %v1477_v52 = vsel %vm833_vm4, %v1438_v7, 0.0  ;;  %1575 = vst.msk [vmem:[%s2675_s25 + $0x20] sm:$0xf] %vm1566_vm6, %v1542_v56  ;;  %v1074_v57 = vpop.f32.mrf.mxu0  ;;  %v1179_v40 = vpop.f32.mrf.mxu1 }
 0x16f   : > { %v1478_v25 = vadd.f32 %v1477_v52, %v1476_v4  ;;  %v1178_v36 = vadd.f32 %v1177_v19, %v1074_v57 }
 0x171   : > { %v2746_v45 = vpop.f32.mrf.mxu3  ;;  %v1271_v53 = vpop.f32.mrf.mxu2 }
 0x172   : > { %v1338_v61 = vadd.f32 %v1271_v53, %v1175_v11 }
 0x174   : > { %v1378_v42 = vsel %vm833_vm4, %v1338_v61, 0.0  ;;  %v1439_v39 = vmul.f32 %v1338_v61, %v1338_v61  ;;  %v1543_v46 = vpack.c.bf16 %v1338_v61, %v1338_v61 }
 0x175   : > { %v1379_v49 = vadd.f32 %v1378_v42, %v1377_v8 }
 0x176   : > { %v1479_v30 = vsel %vm833_vm4, %v1439_v39, 0.0  ;;  %1576 = vst.msk [vmem:[%s2675_s25 + $0x24] sm:$0xf] %vm1566_vm6, %v1543_v46  ;;  %v1076_v62 = vpop.f32.mrf.mxu0  ;;  %v1182_v22 = vpop.f32.mrf.mxu1 }
 0x177   : > { %v1480_v23 = vadd.f32 %v1479_v30, %v1478_v25  ;;  %v1180_v6 = vadd.f32 %v1179_v40, %v1076_v62 }
 0x179   : > { %v2752_v12 = vpop.f32.mrf.mxu3  ;;  %v1274_v47 = vpop.f32.mrf.mxu2 }
 0x17a   : > { %v1339_v14 = vadd.f32 %v1274_v47, %v1178_v36 }
 0x17c   : > { %v1380_v32 = vsel %vm833_vm4, %v1339_v14, 0.0  ;;  %v1440_v31 = vmul.f32 %v1339_v14, %v1339_v14  ;;  %v1544_v15 = vpack.c.bf16 %v1339_v14, %v1339_v14 }
 0x17d   : > { %v1381_v58 = vadd.f32 %v1380_v32, %v1379_v49 }
 0x17e   : > { %v1481_v59 = vsel %vm833_vm4, %v1440_v31, 0.0  ;;  %1577 = vst.msk [vmem:[%s2675_s25 + $0x28] sm:$0xf] %vm1566_vm6, %v1544_v15  ;;  %v1079_v16 = vpop.f32.mrf.mxu0  ;;  %v1184_v13 = vpop.f32.mrf.mxu1 }
 0x17f   : > { %v1482_v63 = vadd.f32 %v1481_v59, %v1480_v23  ;;  %v1183_v2 = vadd.f32 %v1182_v22, %v1079_v16 }
 0x181   : > { %v2758_v17 = vpop.f32.mrf.mxu3  ;;  %v1276_v9 = vpop.f32.mrf.mxu2 }
 0x182   : > { %v1340_v51 = vadd.f32 %v1276_v9, %v1180_v6 }
 0x184   : > { %v1382_v33 = vsel %vm833_vm4, %v1340_v51, 0.0  ;;  %v1441_v41 = vmul.f32 %v1340_v51, %v1340_v51  ;;  %v1545_v0 = vpack.c.bf16 %v1340_v51, %v1340_v51 }
 0x185   : > { %v1383_v20 = vadd.f32 %v1382_v33, %v1381_v58  ;;  %v1213_v33 = vadd.f32 %v2752_v12, %v2689_v38  ;;  %v1215_v38 = vadd.f32 %v2758_v17, %v2697_v37 }
 0x186   : > { %v1483_v48 = vsel %vm833_vm4, %v1441_v41, 0.0  ;;  %1578 = vst.msk [vmem:[%s2675_s25 + $0x2c] sm:$0xf] %vm1566_vm6, %v1545_v0  ;;  %v1081_v1 = vpop.f32.mrf.mxu0  ;;  %v1187_v26 = vpop.f32.mrf.mxu1 }
 0x187   : > { %v1484_v24 = vadd.f32 %v1483_v48, %v1482_v63  ;;  %v1185_v54 = vadd.f32 %v1184_v13, %v1081_v1 }
 0x189   : > { %v2764_v34 = vpop.f32.mrf.mxu3  ;;  %v1279_v28 = vpop.f32.mrf.mxu2 }
 0x18a   : > { %v1341_v21 = vadd.f32 %v1279_v28, %v1183_v2  ;;  %v1218_v37 = vadd.f32 %v2764_v34, %v2707_v35 }
 0x18c   : > { %v1384_v3 = vsel %vm833_vm4, %v1341_v21, 0.0  ;;  %v1442_v18 = vmul.f32 %v1341_v21, %v1341_v21  ;;  %v1546_v10 = vpack.c.bf16 %v1341_v21, %v1341_v21 }
 0x18d   : > { %v2767_v43 = vadd.f32 %v1384_v3, %v1383_v20 }
 0x18e   : > { %v1485_v4 = vsel %vm833_vm4, %v1442_v18, 0.0  ;;  %1579 = vst.msk [vmem:[%s2675_s25 + $0x30] sm:$0xf] %vm1566_vm6, %v1546_v10  ;;  %v1084_v19 = vpop.f32.mrf.mxu0  ;;  %v1189_v5 = vpop.f32.mrf.mxu1 }
 0x18f   : > { %v2772_v44 = vadd.f32 %v1485_v4, %v1484_v24  ;;  %v1188_v57 = vadd.f32 %v1187_v26, %v1084_v19 }
 0x191   : > { %v2774_v55 = vpop.f32.mrf.mxu3  ;;  %v1281_v7 = vpop.f32.mrf.mxu2 }
 0x192   : > { %v2776_v56 = vadd.f32 %v1281_v7, %v1185_v54  ;;  %v1220_v34 = vadd.f32 %v2774_v55, %v2716_v27 }
 0x194   : > { %v1547_v8 = vpack.c.bf16 %v2776_v56, %v2776_v56  ;;  %v1386_v35 = vsel %vm833_vm4, %v2776_v56, 0.0 }
 0x196   : > { %1580 = vst.msk [vmem:[%s2675_s25 + $0x34] sm:$0xf] %vm1566_vm6, %v1547_v8  ;;  %v1086_v52 = vpop.f32.mrf.mxu0  ;;  %v1192_v25 = vpop.f32.mrf.mxu1 }
 0x197   : > { %v1190_v39 = vadd.f32 %v1189_v5, %v1086_v52 }
 0x199   : > { %v2782_v40 = vpop.f32.mrf.mxu3  ;;  %v1284_v11 = vpop.f32.mrf.mxu2 }
 0x19a   : > { %v2784_v53 = vadd.f32 %v1284_v11, %v1188_v57 }
 0x19c   : > { %v1548_v61 = vpack.c.bf16 %v2784_v53, %v2784_v53 }
 0x19e   : > { %1581 = vst.msk [vmem:[%s2675_s25 + $0x38] sm:$0xf] %vm1566_vm6, %v1548_v61  ;;  %v1089_v42 = vpop.f32.mrf.mxu0  ;;  %v1194_v30 = vpop.f32.mrf.mxu1  ;;  %v1444_v61 = vmul.f32 %v2784_v53, %v2784_v53 }
 0x19f   : > { %v1193_v36 = vadd.f32 %v1192_v25, %v1089_v42  ;;  %v1443_v25 = vmul.f32 %v2776_v56, %v2776_v56 }
 0x1a0   : > { %v1489_v56 = vsel %vm833_vm4, %v1444_v61, 0.0 }
 0x1a1   : > { %v2790_v46 = vpop.f32.mrf.mxu3  ;;  %v1286_v49 = vpop.f32.mrf.mxu2 }
 0x1a2   : > { %v2792_v62 = vadd.f32 %v1286_v49, %v1190_v39  ;;  %v1487_v39 = vsel %vm833_vm4, %v1443_v25, 0.0  ;;  %v1388_v49 = vsel %vm833_vm4, %v2784_v53, 0.0 }
 0x1a3   : > { %v1488_v53 = vadd.f32 %v1487_v39, %v2772_v44 }
 0x1a4   : > { %v1549_v23 = vpack.c.bf16 %v2792_v62, %v2792_v62  ;;  %v1390_v27 = vsel %vm833_vm4, %v2792_v62, 0.0 }
 0x1a6   : > { %1582 = vst.msk [vmem:[%s2675_s25 + $0x3c] sm:$0xf] %vm1566_vm6, %v1549_v23  ;;  %v1091_v22 = vpop.f32.mrf.mxu0  ;;  %v1197_v31 = vpop.f32.mrf.mxu1 }
 0x1a7   : > { %v1195_v59 = vadd.f32 %v1194_v30, %v1091_v22  ;;  %v1445_v30 = vmul.f32 %v2792_v62, %v2792_v62  ;;  %v1387_v22 = vadd.f32 %v1386_v35, %v2767_v43 }
 0x1a9   : > { %v2798_v47 = vpop.f32.mrf.mxu3  ;;  %v1289_v14 = vpop.f32.mrf.mxu2  ;;  %v1491_v43 = vsel %vm833_vm4, %v1445_v30, 0.0 }
 0x1aa   : > { %v2800_v32 = vadd.f32 %v1289_v14, %v1193_v36 }
 0x1ac   : > { %v1550_v15 = vpack.c.bf16 %v2800_v32, %v2800_v32  ;;  %v1446_v55 = vmul.f32 %v2800_v32, %v2800_v32 }
 0x1ae   : > { %1583 = vst.msk [vmem:[%s2675_s25 + $0x40] sm:$0xf] %vm1566_vm6, %v1550_v15  ;;  %v1094_v58 = vpop.f32.mrf.mxu0  ;;  %v1199_v9 = vpop.f32.mrf.mxu1 }
 0x1af   : > { %v1198_v41 = vadd.f32 %v1197_v31, %v1094_v58  ;;  %v1389_v58 = vadd.f32 %v1388_v49, %v1387_v22 }
 0x1b1   : > { %v2806_v16 = vpop.f32.mrf.mxu3  ;;  %v1291_v63 = vpop.f32.mrf.mxu2 }
 0x1b2   : > { %v2808_v13 = vadd.f32 %v1291_v63, %v1195_v59  ;;  %v1392_v63 = vsel %vm833_vm4, %v2800_v32, 0.0  ;;  %v1223_v32 = vadd.f32 %v2782_v40, %v2726_v50 }
 0x1b4   : > { %v1551_v6 = vpack.c.bf16 %v2808_v13, %v2808_v13  ;;  %v1447_v62 = vmul.f32 %v2808_v13, %v2808_v13 }
 0x1b6   : > { %1584 = vst.msk [vmem:[%s2675_s25 + $0x44] sm:$0xf] %vm1566_vm6, %v1551_v6  ;;  %v1096_v51 = vpop.f32.mrf.mxu0  ;;  %v1202_v28 = vpop.f32.mrf.mxu1 }
 0x1b7   : > { %v1200_v12 = vadd.f32 %v1199_v9, %v1096_v51  ;;  %v1490_v9 = vadd.f32 %v1489_v56, %v1488_v53  ;;  %v1391_v51 = vadd.f32 %v1390_v27, %v1389_v58 }
 0x1b9   : > { %v1294_v0 = vpop.f32.mrf.mxu2  ;;  %v1309_v20 = vpop.f32.mrf.mxu3 }
 0x1ba   : > { %v2816_v48 = vadd.f32 %v1294_v0, %v1198_v41  ;;  %v2818_v1 = vadd.f32 %v1309_v20, %v1213_v33  ;;  %v1493_v0 = vsel %vm833_vm4, %v1446_v55, 0.0  ;;  %v1394_v20 = vsel %vm833_vm4, %v2808_v13, 0.0 }
 0x1bc   : > { %v1552_v24 = vpack.c.bf16 %v2816_v48, %v2816_v48  ;;  %v1558_v26 = vpack.c.bf16 %v2818_v1, %v2818_v1  ;;  %v1448_v33 = vmul.f32 %v2816_v48, %v2816_v48 }
 0x1be   : > { %1585 = vst.msk [vmem:[%s2675_s25 + $0x48] sm:$0xf] %vm1566_vm6, %v1552_v24  ;;  %v1099_v2 = vpop.f32.mrf.mxu0  ;;  %v1204_v57 = vpop.f32.mrf.mxu1  ;;  %v1492_v24 = vadd.f32 %v1491_v43, %v1490_v9  ;;  %v1497_v13 = vsel %vm833_vm4, %v1448_v33, 0.0 }
 0x1bf   : > { %1591 = vst.msk [vmem:[%s2675_s25 + $0x60] sm:$0xf] %vm1566_vm6, %v1558_v26  ;;  %v1203_v17 = vadd.f32 %v1202_v28, %v1099_v2  ;;  %v1393_v26 = vadd.f32 %v1392_v63, %v1391_v51  ;;  %v1495_v2 = vsel %vm833_vm4, %v1447_v62, 0.0 }
 0x1c1   : > { %v1296_v21 = vpop.f32.mrf.mxu2  ;;  %v1311_v3 = vpop.f32.mrf.mxu3 }
 0x1c2   : > { %v1348_v18 = vadd.f32 %v1296_v21, %v1200_v12  ;;  %v2830_v10 = vadd.f32 %v1311_v3, %v1215_v38  ;;  %v1396_v38 = vsel %vm833_vm4, %v2816_v48, 0.0  ;;  %v1494_v21 = vadd.f32 %v1493_v0, %v1492_v24 }
 0x1c3   : > { %v1395_v3 = vadd.f32 %v1394_v20, %v1393_v26  ;;  %v1228_v24 = vadd.f32 %v2798_v47, %v2740_v29 }
 0x1c4   : > { %v1553_v4 = vpack.c.bf16 %v1348_v18, %v1348_v18  ;;  %v1559_v19 = vpack.c.bf16 %v2830_v10, %v2830_v10  ;;  %v1449_v12 = vmul.f32 %v1348_v18, %v1348_v18 }
 0x1c6   : > { %1586 = vst.msk [vmem:[%s2675_s25 + $0x4c] sm:$0xf] %vm1566_vm6, %v1553_v4  ;;  %v1101_v5 = vpop.f32.mrf.mxu0  ;;  %v1207_v41 = vpop.f32.mrf.mxu1  ;;  %v1499_v48 = vsel %vm833_vm4, %v1449_v12, 0.0 }
 0x1c7   : > { %1592 = vst.msk [vmem:[%s2675_s25 + $0x64] sm:$0xf] %vm1566_vm6, %v1559_v19  ;;  %v1205_v23 = vadd.f32 %v1204_v57, %v1101_v5  ;;  %v1496_v5 = vadd.f32 %v1495_v2, %v1494_v21  ;;  %v1410_v2 = vsel %vm833_vm4, %v2830_v10, 0.0 }
 0x1c9   : > { %v1299_v54 = vpop.f32.mrf.mxu2  ;;  %v1314_v7 = vpop.f32.mrf.mxu3 }
 0x1ca   : > { %v1349_v8 = vadd.f32 %v1299_v54, %v1203_v17  ;;  %v2840_v52 = vadd.f32 %v1314_v7, %v1218_v37  ;;  %v1398_v37 = vsel %vm833_vm4, %v1348_v18, 0.0  ;;  %v1397_v54 = vadd.f32 %v1396_v38, %v1395_v3 }
 0x1cc   : > { %v1554_v11 = vpack.c.bf16 %v1349_v8, %v1349_v8  ;;  %v1560_v42 = vpack.c.bf16 %v2840_v52, %v2840_v52  ;;  %v1450_v50 = vmul.f32 %v1349_v8, %v1349_v8  ;;  %v1400_v7 = vsel %vm833_vm4, %v1349_v8, 0.0 }
 0x1cd   : > { %v1399_v61 = vadd.f32 %v1398_v37, %v1397_v54  ;;  %v1225_v8 = vadd.f32 %v2790_v46, %v2732_v60  ;;  %v1454_v60 = vmul.f32 %v2818_v1, %v2818_v1  ;;  %v1412_v3 = vsel %vm833_vm4, %v2840_v52, 0.0 }
 0x1ce   : > { %1587 = vst.msk [vmem:[%s2675_s25 + $0x50] sm:$0xf] %vm1566_vm6, %v1554_v11  ;;  %v1104_v59 = vpop.f32.mrf.mxu0  ;;  %v1498_v11 = vadd.f32 %v1497_v13, %v1496_v5  ;;  %v1501_v35 = vsel %vm833_vm4, %v1450_v50, 0.0 }
 0x1cf   : > { %1593 = vst.msk [vmem:[%s2675_s25 + $0x68] sm:$0xf] %vm1566_vm6, %v1560_v42  ;;  %v1208_v28 = vadd.f32 %v1207_v41, %v1104_v59  ;;  %v1401_v30 = vadd.f32 %v1400_v7, %v1399_v61  ;;  %v1408_v41 = vsel %vm833_vm4, %v2818_v1, 0.0  ;;  %v1509_v26 = vsel %vm833_vm4, %v1454_v60, 0.0 }
 0x1d0   : > { %v1500_v49 = vadd.f32 %v1499_v48, %v1498_v11  ;;  %v1456_v1 = vmul.f32 %v2840_v52, %v2840_v52 }
 0x1d1   : > { %v1301_v36 = vpop.f32.mrf.mxu2  ;;  %v1316_v14 = vpop.f32.mrf.mxu3 }
 0x1d2   : > { %v1350_v31 = vadd.f32 %v1301_v36, %v1205_v23  ;;  %v2867_v15 = vadd.f32 %v1316_v14, %v1220_v34  ;;  %v1209_v23 = vpop.f32.mrf.mxu1  ;;  %v1502_v14 = vadd.f32 %v1501_v35, %v1500_v49 }
 0x1d4   : > { %v1555_v6 = vpack.c.bf16 %v1350_v31, %v1350_v31  ;;  %v1561_v44 = vpack.c.bf16 %v2867_v15, %v2867_v15  ;;  %v1451_v57 = vmul.f32 %v1350_v31, %v1350_v31  ;;  %v1402_v34 = vsel %vm833_vm4, %v1350_v31, 0.0 }
 0x1d5   : > { %v1403_v27 = vadd.f32 %v1402_v34, %v1401_v30  ;;  %v1457_v29 = vmul.f32 %v2867_v15, %v2867_v15 }
 0x1d6   : > { %1588 = vst.msk [vmem:[%s2675_s25 + $0x54] sm:$0xf] %vm1566_vm6, %v1555_v6  ;;  %v1106_v42 = vpop.f32.mrf.mxu0  ;;  %v1503_v22 = vsel %vm833_vm4, %v1451_v57, 0.0 }
 0x1d7   : > { %1594 = vst.msk [vmem:[%s2675_s25 + $0x6c] sm:$0xf] %vm1566_vm6, %v1561_v44  ;;  %v1210_v56 = vadd.f32 %v1209_v23, %v1106_v42  ;;  %v1504_v43 = vadd.f32 %v1503_v22, %v1502_v14  ;;  %v1455_v44 = vmul.f32 %v2830_v10, %v2830_v10  ;;  %v1513_v10 = vsel %vm833_vm4, %v1456_v1, 0.0 }
 0x1d8   : > { %v1515_v54 = vsel %vm833_vm4, %v1457_v29, 0.0 }
 0x1d9   : > { %v1304_v4 = vpop.f32.mrf.mxu2  ;;  %v1319_v19 = vpop.f32.mrf.mxu3  ;;  %v1511_v21 = vsel %vm833_vm4, %v1455_v44, 0.0 }
 0x1da   : > { %v1351_v40 = vadd.f32 %v1304_v4, %v1208_v28  ;;  %v2893_v17 = vadd.f32 %v1319_v19, %v1223_v32  ;;  %v1414_v19 = vsel %vm833_vm4, %v2867_v15, 0.0 }
 0x1dc   : > { %v1556_v25 = vpack.c.bf16 %v1351_v40, %v1351_v40  ;;  %v1562_v18 = vpack.c.bf16 %v2893_v17, %v2893_v17  ;;  %v1452_v39 = vmul.f32 %v1351_v40, %v1351_v40  ;;  %v1404_v36 = vsel %vm833_vm4, %v1351_v40, 0.0 }
 0x1dd   : > { %v1405_v63 = vadd.f32 %v1404_v36, %v1403_v27  ;;  %v1458_v37 = vmul.f32 %v2893_v17, %v2893_v17  ;;  %v1416_v52 = vsel %vm833_vm4, %v2893_v17, 0.0 }
 0x1de   : > { %1589 = vst.msk [vmem:[%s2675_s25 + $0x58] sm:$0xf] %vm1566_vm6, %v1556_v25  ;;  %v1505_v53 = vsel %vm833_vm4, %v1452_v39, 0.0  ;;  %v1230_v25 = vadd.f32 %v2806_v16, %v2746_v45 }
 0x1df   : > { %1595 = vst.msk [vmem:[%s2675_s25 + $0x70] sm:$0xf] %vm1566_vm6, %v1562_v18  ;;  %v1506_v9 = vadd.f32 %v1505_v53, %v1504_v43  ;;  %v1517_v15 = vsel %vm833_vm4, %v1458_v37, 0.0 }
 0x1e1   : > { %v1306_v55 = vpop.f32.mrf.mxu2  ;;  %v1321_v31 = vpop.f32.mrf.mxu3 }
 0x1e2   : > { %v1352_v58 = vadd.f32 %v1306_v55, %v1210_v56  ;;  %v1358_v59 = vadd.f32 %v1321_v31, %v1225_v8 }
 0x1e4   : > { %v1406_v46 = vsel %vm833_vm4, %v1352_v58, 0.0  ;;  %v1453_v62 = vmul.f32 %v1352_v58, %v1352_v58  ;;  %v1557_v6 = vpack.c.bf16 %v1352_v58, %v1352_v58  ;;  %v1563_v33 = vpack.c.bf16 %v1358_v59, %v1358_v59 }
 0x1e5   : > { %v1407_v51 = vadd.f32 %v1406_v46, %v1405_v63  ;;  %v1459_v48 = vmul.f32 %v1358_v59, %v1358_v59  ;;  %v1418_v11 = vsel %vm833_vm4, %v1358_v59, 0.0 }
 0x1e6   : > { %v1507_v0 = vsel %vm833_vm4, %v1453_v62, 0.0  ;;  %1590 = vst.msk [vmem:[%s2675_s25 + $0x5c] sm:$0xf] %vm1566_vm6, %v1557_v6 }
 0x1e7   : > { %v1409_v20 = vadd.f32 %v1408_v41, %v1407_v51  ;;  %v1508_v32 = vadd.f32 %v1507_v0, %v1506_v9  ;;  %1596 = vst.msk [vmem:[%s2675_s25 + $0x74] sm:$0xf] %vm1566_vm6, %v1563_v33  ;;  %v1519_v17 = vsel %vm833_vm4, %v1459_v48, 0.0 }
 0x1e9   : > { %v1411_v38 = vadd.f32 %v1410_v2, %v1409_v20  ;;  %v1510_v12 = vadd.f32 %v1509_v26, %v1508_v32  ;;  %v1324_v28 = vpop.f32.mrf.mxu3 }
 0x1ea   : > { %v1359_v47 = vadd.f32 %v1324_v28, %v1228_v24 }
 0x1eb   : > { %v1512_v13 = vadd.f32 %v1511_v21, %v1510_v12  ;;  %v1413_v4 = vadd.f32 %v1412_v3, %v1411_v38 }
 0x1ec   : > { %v1564_v50 = vpack.c.bf16 %v1359_v47, %v1359_v47  ;;  %v1460_v61 = vmul.f32 %v1359_v47, %v1359_v47  ;;  %v1420_v34 = vsel %vm833_vm4, %v1359_v47, 0.0 }
 0x1ed   : > { %v1415_v40 = vadd.f32 %v1414_v19, %v1413_v4  ;;  %v1514_v5 = vadd.f32 %v1513_v10, %v1512_v13 }
 0x1ee   : > { %1597 = vst.msk [vmem:[%s2675_s25 + $0x78] sm:$0xf] %vm1566_vm6, %v1564_v50  ;;  %v1521_v23 = vsel %vm833_vm4, %v1460_v61, 0.0 }
 0x1ef   : > { %v1417_v7 = vadd.f32 %v1416_v52, %v1415_v40  ;;  %v1516_v57 = vadd.f32 %v1515_v54, %v1514_v5 }
 0x1f1   : > { %v1419_v42 = vadd.f32 %v1418_v11, %v1417_v7  ;;  %v1518_v18 = vadd.f32 %v1517_v15, %v1516_v57  ;;  %v1326_v35 = vpop.f32.mrf.mxu3 }
 0x1f2   : > { %v1360_v39 = vadd.f32 %v1326_v35, %v1230_v25 }
 0x1f3   : > { %v1520_v49 = vadd.f32 %v1519_v17, %v1518_v18  ;;  %v1421_v30 = vadd.f32 %v1420_v34, %v1419_v42 }
 0x1f4   : > { %v1422_v45 = vsel %vm833_vm4, %v1360_v39, 0.0  ;;  %v1461_v16 = vmul.f32 %v1360_v39, %v1360_v39  ;;  %v1565_v8 = vpack.c.bf16 %v1360_v39, %v1360_v39 }
 0x1f5   : > { %v1522_v22 = vadd.f32 %v1521_v23, %v1520_v49  ;;  %v1423_v56 = vadd.f32 %v1422_v45, %v1421_v30 }
 0x1f6   : > { %v1523_v36 = vsel %vm833_vm4, %v1461_v16, 0.0  ;;  %1598 = vst.msk [vmem:[%s2675_s25 + $0x7c] sm:$0xf] %vm1566_vm6, %v1565_v8 }
 0x1f7   : > { %v1424_v14 = vrot.slane %v1423_v56, 4  ;;  %v1524_v27 = vadd.f32 %v1523_v36, %v1522_v22 }
 0x1f9   : > { %v1425_v55 = vadd.f32 %v1424_v14, %v1423_v56  ;;  %v1525_v31 = vrot.slane %v1524_v27, 4 }
 0x1fb   : > { %v1426_v53 = vrot.slane %v1425_v55, 2  ;;  %v1526_v58 = vadd.f32 %v1525_v31, %v1524_v27 }
 0x1fd   : > { %v1427_v59 = vadd.f32 %v1426_v53, %v1425_v55  ;;  %v1527_v43 = vrot.slane %v1526_v58, 2 }
 0x1ff   : > { %v1428_v63 = vrot.slane %v1427_v59, 1  ;;  %v1528_v60 = vadd.f32 %v1527_v43, %v1526_v58 }
 0x201   : > { %v1529_v46 = vrot.slane %v1528_v60, 1  ;;  %v1429_v62 = vadd.f32 %v1428_v63, %v1427_v59 }
 0x203   : > { %v1530_v6 = vadd.f32 %v1529_v46, %v1528_v60 }
 0x205   : > { %v1531_v9 = vsel %vm248_vm0, %v1429_v62, %v1530_v6 }
 0x206   : > { %1533 = vst.msk [vmem:[%s171_s4] sm:$0x3] %vm1532_vm7, %v1531_v9 }
 0x207   : > { %2028 = shalt.err (!%p2025_p3)
}
 0x208   : > { %1789 = dma.vmem_to_hbm [thread:$0]  (%p2126_p5), %s1621_s5, 32, %s1623_s6, %s1605_s16  }
 0x209 PF: > { %p1795_p4 = scmp.ge.s32.totalorder %s2063_s15, 2  ;;  %s1642_s20 = sand.u32 1, %s2051_s12  }
 0x20a   : > { %s1643_s25 = scalar_lea.sflag [#allocation3], %s1642_s20 }
 0x20b   : > { %p1792_p7 = pnand %p1795_p4, %p2130_p6 }
 0x20d   : > { %p1793_p8 = pneg %p1792_p7 }
 0x20f   : > { %2046 = dma.done.wait (%p1793_p8), %s1643_s25, 32  }
 0x210   : > { %2048 = vsyncadd (%p1793_p8), %s1643_s25, 4294967264  ;;  %p14_p9 = scmp.ge.s32.totalorder %s2113_s18, 4   ;;  %s2994_s12 = smov %s2055_s13 }
 0x211   : > { %s2995_s13 = smov %s2059_s14  ;;  %s2996_s14 = smov %s2124_s21 }
 0x212   : > { %s2997_s15 = smov %s2113_s18  ;;  %16 = sbr.rel (!%p14_p9) target bundleno = 3 (0x3), region = 75 }
 0x217   :  { %1649 = vsyncpa [#allocation3], 1 }
 0x218   :  { %1651 = vsyncpa [#allocation3 + $0x1], 1 }

</bundles_post_ra>
